<compile_context>
chip_gen: v7x
topology: tpu7x:2x2x1
jax: 0.10.0
libtpu: 0.0.40
codegen_flags: <defaults>
</compile_context>

<pallas_src>
import jax
import jax.numpy as jnp
from jax.experimental import pallas as pl
from jax.experimental.pallas import tpu as pltpu

EPS = 1e-5


def fused_kernel(w_ref, x_ref, gamma_ref, beta_ref, o_ref):
    # w_ref:     (Cout_blk, Cin)  bf16   1x1-conv weight (native orientation)
    # x_ref:     (Cin, P)         f32    activations, P = N*H*W
    # gamma_ref: (Cout_blk, 1)    f32
    # beta_ref:  (Cout_blk, 1)    f32
    # o_ref:     (Cout_blk, P)    f32
    x = jnp.maximum(x_ref[...], 0.0)                    # relu148 (inplace ReLU)
    x_bf = x.astype(jnp.bfloat16)                       # MXU input precision only

    # conv2d148: 1x1 conv, no bias == contraction over Cin on the MXU.
    # bf16 x bf16 operands, f32 accumulation.
    y = jax.lax.dot_general(
        w_ref[...], x_bf,
        dimension_numbers=(((1,), (0,)), ((), ())),
        preferred_element_type=jnp.float32,
    )                                                   # (Cout_blk, P) f32

    # batchnorm2d149 (training-mode forward): per-channel batch stats over
    # (N, H, W) == over the P axis, biased variance, all in f32.
    p = y.shape[1]
    inv_p = 1.0 / p
    mean = jnp.sum(y, axis=1, keepdims=True) * inv_p            # (Cout_blk, 1)
    centered = y - mean
    var = jnp.sum(centered * centered, axis=1, keepdims=True) * inv_p

    # Fold the BN affine into one per-channel scale/shift so the epilogue is a
    # single fused multiply-add + ReLU pass over the tile.
    scale = gamma_ref[...] * jax.lax.rsqrt(var + EPS)           # (Cout_blk, 1)
    shift = beta_ref[...] - mean * scale                        # (Cout_blk, 1)
    o_ref[...] = jnp.maximum(y * scale + shift, 0.0)            # relu149
    # TODO(synk): BatchNorm2d running_mean/running_var state update is not
    # reproduced (only the forward output is computed).


def _cout_splits(cout: int) -> int:
    """2-way Cout split only on 2-TensorCore chips (v7x); gridless elsewhere."""
    try:
        kind = jax.devices()[0].device_kind.lower()
    except Exception:
        return 1
    if ("v7" in kind or "7x" in kind) and cout % 2 == 0:
        return 2
    return 1


def fused_relu_conv_bn_relu(x_nchw, w_conv, gamma, beta):
    """x_nchw: (1, Cin, H, W) f32; w_conv: (Cout, Cin) f32; gamma/beta: (Cout,) f32."""
    n, cin, h, w = x_nchw.shape
    assert n == 1, "module spec has batch size 1 (free NCHW -> (Cin, P) view)"
    cout = w_conv.shape[0]
    p = n * h * w

    # Free, contiguous reshapes only -- no wrapper transposes.
    x_cp = x_nchw.reshape(cin, p)                 # (Cin, P)
    gamma2 = gamma.reshape(cout, 1)
    beta2 = beta.reshape(cout, 1)

    # bf16 weight: halves the dominant HBM DMA (672 KB -> 336 KB). In the real
    # model the parameter is stored pre-cast (and prefetched across calls, P10)
    # rather than cast per call.
    w_bf16 = w_conv.astype(jnp.bfloat16)

    cost = pl.CostEstimate(
        flops=2 * p * cin * cout,
        bytes_accessed=(cin * p * 4            # f32 activations in
                        + cout * cin * 2       # bf16 weights in
                        + 2 * cout * 4         # gamma/beta in
                        + cout * p * 4),       # f32 output
        transcendentals=cout,                  # one rsqrt per output channel
    )

    splits = _cout_splits(cout)
    if splits == 1:
        # v5e/v6e: gridless, whole arrays resident in VMEM, single invocation.
        vmem_spec = pl.BlockSpec(memory_space=pltpu.MemorySpace.VMEM)
        out_cp = pl.pallas_call(
            fused_kernel,
            out_shape=jax.ShapeDtypeStruct((cout, p), jnp.float32),
            in_specs=[vmem_spec, vmem_spec, vmem_spec, vmem_spec],
            out_specs=vmem_spec,
            cost_estimate=cost,
        )(w_bf16, x_cp, gamma2, beta2)
    else:
        # v7x: split Cout across both TensorCores ("parallel" grid axis).
        cb = cout // splits
        out_cp = pl.pallas_call(
            fused_kernel,
            out_shape=jax.ShapeDtypeStruct((cout, p), jnp.float32),
            grid=(splits,),
            in_specs=[
                pl.BlockSpec((cb, cin), lambda i: (i, 0)),   # weight half
                pl.BlockSpec((cin, p), lambda i: (0, 0)),    # full activations
                pl.BlockSpec((cb, 1), lambda i: (i, 0)),     # gamma half
                pl.BlockSpec((cb, 1), lambda i: (i, 0)),     # beta half
            ],
            out_specs=pl.BlockSpec((cb, p), lambda i: (i, 0)),
            compiler_params=pltpu.CompilerParams(
                dimension_semantics=("parallel",)),
            cost_estimate=cost,
        )(w_bf16, x_cp, gamma2, beta2)

    # (Cout, P) -> (1, Cout, H, W): free reshape, no transpose.
    return out_cp.reshape(n, cout, h, w)


if __name__ == "__main__":
    key = jax.random.PRNGKey(0)
    k_x, k_w, k_g, k_b = jax.random.split(key, 4)

    N, CIN, H, W = 1, 1344, 7, 7
    COUT = 128

    x525 = jax.random.normal(k_x, (N, CIN, H, W), dtype=jnp.float32)
    # Conv2d(1344, 128, 1, 1, bias=False) weight: (Cout, Cin, 1, 1) -> (Cout, Cin)
    w_conv = jax.random.normal(k_w, (COUT, CIN), dtype=jnp.float32) * 0.02
    # BatchNorm2d(128, affine=True): deterministic (non-default) gamma/beta
    gamma = 1.0 + 0.1 * jax.random.normal(k_g, (COUT,), dtype=jnp.float32)
    beta = 0.1 * jax.random.normal(k_b, (COUT,), dtype=jnp.float32)

    out = fused_relu_conv_bn_relu(x525, w_conv, gamma, beta)
    out = jax.block_until_ready(out)

    assert out.shape == (N, COUT, H, W), out.shape
    assert out.dtype == jnp.float32
    assert bool(jnp.isfinite(out).all())
    print("KERNEL_OK")
</pallas_src>

<mosaic_0001>
module attributes {stable_mosaic.version = 11 : i64} {
  func.func @fused_kernel(%arg0: memref<128x1344xbf16, #tpu.memory_space<vmem>>, %arg1: memref<1344x49xf32, #tpu.memory_space<vmem>>, %arg2: memref<128x1xf32, #tpu.memory_space<vmem>>, %arg3: memref<128x1xf32, #tpu.memory_space<vmem>>, %arg4: memref<128x49xf32, #tpu.memory_space<vmem>>) attributes {dimension_semantics = [], scalar_prefetch = 0 : i64, scratch_operands = 0 : i64, tpu.core_type = #tpu.core_type<tc>} {
    %c0 = arith.constant 0 : index
    %c0_0 = arith.constant 0 : index
    %0 = vector.load %arg1[%c0, %c0_0] : memref<1344x49xf32, #tpu.memory_space<vmem>>, vector<1344x49xf32>
    %cst = arith.constant 0.000000e+00 : f32
    %1 = vector.broadcast %cst : f32 to vector<1344x49xf32>
    %2 = arith.maximumf %0, %1 : vector<1344x49xf32>
    %3 = arith.truncf %2 : vector<1344x49xf32> to vector<1344x49xbf16>
    %c0_1 = arith.constant 0 : index
    %c0_2 = arith.constant 0 : index
    %4 = vector.load %arg0[%c0_1, %c0_2] : memref<128x1344xbf16, #tpu.memory_space<vmem>>, vector<128x1344xbf16>
    %cst_3 = arith.constant dense<0.000000e+00> : vector<128x49xf32>
    %5 = tpu.matmul %4, %3, %cst_3 {dimension_numbers = #tpu.dot_dimension_numbers<[1], [0], [0], [1], [0, 0, 1, 1], [], []>} : vector<128x1344xbf16>, vector<1344x49xbf16>, vector<128x49xf32> -> vector<128x49xf32>
    %cst_4 = arith.constant dense<0.000000e+00> : vector<128xf32>
    %6 = vector.multi_reduction <add>, %5, %cst_4 [1] : vector<128x49xf32> to vector<128xf32>
    %7 = vector.shape_cast %6 : vector<128xf32> to vector<128x1xf32>
    %cst_5 = arith.constant 0.0204081628 : f32
    %8 = vector.broadcast %cst_5 : f32 to vector<128x1xf32>
    %9 = arith.mulf %7, %8 : vector<128x1xf32>
    %10 = vector.broadcast %9 : vector<128x1xf32> to vector<128x49xf32>
    %11 = arith.subf %5, %10 : vector<128x49xf32>
    %12 = arith.mulf %11, %11 : vector<128x49xf32>
    %cst_6 = arith.constant dense<0.000000e+00> : vector<128xf32>
    %13 = vector.multi_reduction <add>, %12, %cst_6 [1] : vector<128x49xf32> to vector<128xf32>
    %14 = vector.shape_cast %13 : vector<128xf32> to vector<128x1xf32>
    %cst_7 = arith.constant 0.0204081628 : f32
    %15 = vector.broadcast %cst_7 : f32 to vector<128x1xf32>
    %16 = arith.mulf %14, %15 : vector<128x1xf32>
    %c0_8 = arith.constant 0 : index
    %c0_9 = arith.constant 0 : index
    %17 = vector.load %arg2[%c0_8, %c0_9] : memref<128x1xf32, #tpu.memory_space<vmem>>, vector<128x1xf32>
    %cst_10 = arith.constant 9.99999974E-6 : f32
    %18 = vector.broadcast %cst_10 : f32 to vector<128x1xf32>
    %19 = arith.addf %16, %18 : vector<128x1xf32>
    %20 = math.rsqrt %19 : vector<128x1xf32>
    %21 = arith.mulf %17, %20 : vector<128x1xf32>
    %c0_11 = arith.constant 0 : index
    %c0_12 = arith.constant 0 : index
    %22 = vector.load %arg3[%c0_11, %c0_12] : memref<128x1xf32, #tpu.memory_space<vmem>>, vector<128x1xf32>
    %23 = arith.mulf %9, %21 : vector<128x1xf32>
    %24 = arith.subf %22, %23 : vector<128x1xf32>
    %25 = vector.broadcast %21 : vector<128x1xf32> to vector<128x49xf32>
    %26 = arith.mulf %5, %25 : vector<128x49xf32>
    %27 = vector.broadcast %24 : vector<128x1xf32> to vector<128x49xf32>
    %28 = arith.addf %26, %27 : vector<128x49xf32>
    %cst_13 = arith.constant 0.000000e+00 : f32
    %29 = vector.broadcast %cst_13 : f32 to vector<128x49xf32>
    %30 = arith.maximumf %28, %29 : vector<128x49xf32>
    %c0_14 = arith.constant 0 : index
    %c0_15 = arith.constant 0 : index
    %31 = vector.load %arg4[%c0_14, %c0_15] : memref<128x49xf32, #tpu.memory_space<vmem>>, vector<128x49xf32>
    tpu.vector_store %arg4[%c0_14, %c0_15], %30 {strides = array<i32>} : memref<128x49xf32, #tpu.memory_space<vmem>>, vector<128x49xf32>,
    return
  }
}

</mosaic_0001>

<bundles_post_ra>
// kernel: tpu_custom_call.1
= control target key start
LH: loop header
LB: loop body
LE: loop exit
PB: predicated region body
PF: predicated region fallthrough
CT: control target
= control target key end

     0   :  { %vm974_vm0 = vcmask 523264   ;;  %vm1581_vm1 = vcmask 400384   ;;  %s3947_s1 = inlined_call_operand.vmem [shape: f32[1344,49], index: 1, kind: input, shape index: {}]   ;;  %s3948_s0 = inlined_call_operand.vmem [shape: bf16[128,1344], index: 0, kind: input, shape index: {}]   ;;  %s3949_s2 = inlined_call_operand.vmem [shape: f32[128,1], index: 2, kind: input, shape index: {}]   ;;  %s3950_s3 = inlined_call_operand.vmem [shape: f32[128,1], index: 3, kind: input, shape index: {}]   ;;  %s3951_s4 = inlined_call_operand.vmem [shape: f32[128,49], index: 4, kind: output, shape index: {}]  }
   0x1   :  { %v34_v0 = vld [vmem:[%s3947_s1 + $0x80] sm:$0xff]  ;;  %v35_v1 = vld [vmem:[%s3947_s1 + $0x88] sm:$0xff]  ;;  %v36_v14 = vld [vmem:[%s3947_s1 + $0x90] sm:$0xff] }
   0x2   :  { %v66_v2 = vld [vmem:[%s3947_s1 + $0x180] sm:$0xff]  ;;  %v202_v3 = vmax.f32 %v34_v0, 0.0  ;;  %v203_v4 = vmax.f32 %v35_v1, 0.0  ;;  %v67_v5 = vld [vmem:[%s3947_s1 + $0x188] sm:$0xff]  ;;  %v37_v18 = vld [vmem:[%s3947_s1 + $0x98] sm:$0xff]  ;;  %v204_v19 = vmax.f32 %v36_v14, 0.0 }
   0x3   :  { %v234_v6 = vmax.f32 %v66_v2, 0.0  ;;  %v18_v7 = vld [vmem:[%s3947_s1] sm:$0xff]  ;;  %v19_v8 = vld [vmem:[%s3947_s1 + $0x8] sm:$0xff]  ;;  %v235_v9 = vmax.f32 %v67_v5, 0.0  ;;  %v68_v20 = vld [vmem:[%s3947_s1 + $0x190] sm:$0xff]  ;;  %v205_v24 = vmax.f32 %v37_v18, 0.0 }
   0x4   :  { %v186_v10 = vmax.f32 %v18_v7, 0.0  ;;  %v187_v11 = vmax.f32 %v19_v8, 0.0  ;;  %v50_v12 = vld [vmem:[%s3947_s1 + $0x100] sm:$0xff]  ;;  %v51_v13 = vld [vmem:[%s3947_s1 + $0x108] sm:$0xff]  ;;  %v362_v15 = vpack.c.bf16 %v203_v4, %v202_v3  ;;  %v69_v21 = vld [vmem:[%s3947_s1 + $0x198] sm:$0xff]  ;;  %v236_v25 = vmax.f32 %v68_v20, 0.0 }
   0x5   :  { %v218_v16 = vmax.f32 %v50_v12, 0.0  ;;  %v219_v17 = vmax.f32 %v51_v13, 0.0  ;;  %v378_v22 = vpack.c.bf16 %v235_v9, %v234_v6  ;;  %v20_v26 = vld [vmem:[%s3947_s1 + $0x10] sm:$0xff]  ;;  %v21_v27 = vld [vmem:[%s3947_s1 + $0x18] sm:$0xff]  ;;  %v237_v30 = vmax.f32 %v69_v21, 0.0  ;;  %v38_v34 = vld [vmem:[%s3947_s1 + $0xa0] sm:$0xff] }
   0x6   :  { %v354_v23 = vpack.c.bf16 %v187_v11, %v186_v10  ;;  %v52_v28 = vld [vmem:[%s3947_s1 + $0x110] sm:$0xff]  ;;  %2178 = vmatprep.subr.bf16.mxu0 %v362_v15  ;;  %v188_v31 = vmax.f32 %v20_v26, 0.0  ;;  %v189_v32 = vmax.f32 %v21_v27, 0.0  ;;  %v53_v33 = vld [vmem:[%s3947_s1 + $0x118] sm:$0xff]  ;;  %v39_v35 = vld [vmem:[%s3947_s1 + $0xa8] sm:$0xff]  ;;  %v363_v36 = vpack.c.bf16 %v205_v24, %v204_v19 }
   0x7   :  { %v370_v29 = vpack.c.bf16 %v219_v17, %v218_v16  ;;  %2242 = vmatprep.subr.bf16.mxu1 %v378_v22  ;;  %v220_v37 = vmax.f32 %v52_v28, 0.0  ;;  %v221_v38 = vmax.f32 %v53_v33, 0.0  ;;  %v206_v39 = vmax.f32 %v38_v34, 0.0  ;;  %v70_v40 = vld [vmem:[%s3947_s1 + $0x1a0] sm:$0xff]  ;;  %v71_v41 = vld [vmem:[%s3947_s1 + $0x1a8] sm:$0xff]  ;;  %v40_v54 = vld [vmem:[%s3947_s1 + $0xb0] sm:$0xff] }
   0x8   :  { %2179 = vmatpush3.bf16.msra.mxu0 %v354_v23  ;;  %v22_v42 = vld [vmem:[%s3947_s1 + $0x20] sm:$0xff]  ;;  %v379_v43 = vpack.c.bf16 %v237_v30, %v236_v25  ;;  %v355_v44 = vpack.c.bf16 %v189_v32, %v188_v31  ;;  %v207_v45 = vmax.f32 %v39_v35, 0.0  ;;  %v238_v46 = vmax.f32 %v70_v40, 0.0  ;;  %v23_v47 = vld [vmem:[%s3947_s1 + $0x28] sm:$0xff]  ;;  %v41_v55 = vld [vmem:[%s3947_s1 + $0xb8] sm:$0xff] }
   0x9   :  { %2243 = vmatpush3.bf16.msra.mxu1 %v370_v29  ;;  %v54_v48 = vld [vmem:[%s3947_s1 + $0x120] sm:$0xff]  ;;  %v55_v49 = vld [vmem:[%s3947_s1 + $0x128] sm:$0xff]  ;;  %2180 = vmatprep.subr.bf16.mxu0 %v363_v36  ;;  %v371_v50 = vpack.c.bf16 %v221_v38, %v220_v37  ;;  %v239_v51 = vmax.f32 %v71_v41, 0.0  ;;  %v190_v52 = vmax.f32 %v22_v42, 0.0  ;;  %v191_v53 = vmax.f32 %v23_v47, 0.0  ;;  %v72_v56 = vld [vmem:[%s3947_s1 + $0x1b0] sm:$0xff] }
   0xa   :  { %2244 = vmatprep.subr.bf16.mxu1 %v379_v43  ;;  %v364_v57 = vpack.c.bf16 %v207_v45, %v206_v39  ;;  %v222_v58 = vmax.f32 %v54_v48, 0.0  ;;  %v223_v59 = vmax.f32 %v55_v49, 0.0  ;;  %v208_v60 = vmax.f32 %v40_v54, 0.0  ;;  %v73_v61 = vld [vmem:[%s3947_s1 + $0x1b8] sm:$0xff]  ;;  %v24_v62 = vld [vmem:[%s3947_s1 + $0x30] sm:$0xff]  ;;  %v42_v6 = vld [vmem:[%s3947_s1 + $0xc0] sm:$0xff] }
   0xb   :  { %v25_v63 = vld [vmem:[%s3947_s1 + $0x38] sm:$0xff]  ;;  %v380_v0 = vpack.c.bf16 %v239_v51, %v238_v46  ;;  %v356_v1 = vpack.c.bf16 %v191_v53, %v190_v52  ;;  %v209_v2 = vmax.f32 %v41_v55, 0.0  ;;  %v240_v3 = vmax.f32 %v72_v56, 0.0  ;;  %v56_v4 = vld [vmem:[%s3947_s1 + $0x130] sm:$0xff]  ;;  %v43_v11 = vld [vmem:[%s3947_s1 + $0xc8] sm:$0xff] }
   0xc   :  { %2181 = vmatpush3.bf16.msra.mxu0 %v355_v44  ;;  %v57_v5 = vld [vmem:[%s3947_s1 + $0x138] sm:$0xff]  ;;  %v372_v7 = vpack.c.bf16 %v223_v59, %v222_v58  ;;  %v241_v8 = vmax.f32 %v73_v61, 0.0  ;;  %v192_v9 = vmax.f32 %v24_v62, 0.0  ;;  %v193_v10 = vmax.f32 %v25_v63, 0.0  ;;  %v74_v12 = vld [vmem:[%s3947_s1 + $0x1c0] sm:$0xff]  ;;  %v75_v13 = vld [vmem:[%s3947_s1 + $0x1c8] sm:$0xff] }
   0xd   :  { %2245 = vmatpush3.bf16.msra.mxu1 %v371_v50  ;;  %2182 = vmatprep.subr.bf16.mxu0 %v364_v57  ;;  %v365_v14 = vpack.c.bf16 %v209_v2, %v208_v60  ;;  %v224_v15 = vmax.f32 %v56_v4, 0.0  ;;  %v225_v16 = vmax.f32 %v57_v5, 0.0  ;;  %v210_v17 = vmax.f32 %v42_v6, 0.0  ;;  %v26_v18 = vld [vmem:[%s3947_s1 + $0x40] sm:$0xff]  ;;  %v27_v19 = vld [vmem:[%s3947_s1 + $0x48] sm:$0xff]  ;;  %v44_v26 = vld [vmem:[%s3947_s1 + $0xd0] sm:$0xff] }
   0xe   :  { %2246 = vmatprep.subr.bf16.mxu1 %v380_v0  ;;  %v58_v20 = vld [vmem:[%s3947_s1 + $0x140] sm:$0xff]  ;;  %v381_v21 = vpack.c.bf16 %v241_v8, %v240_v3  ;;  %v357_v22 = vpack.c.bf16 %v193_v10, %v192_v9  ;;  %v211_v23 = vmax.f32 %v43_v11, 0.0  ;;  %v242_v24 = vmax.f32 %v74_v12, 0.0  ;;  %v59_v25 = vld [vmem:[%s3947_s1 + $0x148] sm:$0xff]  ;;  %v45_v27 = vld [vmem:[%s3947_s1 + $0xd8] sm:$0xff] }
   0xf   :  { %v373_v28 = vpack.c.bf16 %v225_v16, %v224_v15  ;;  %v243_v29 = vmax.f32 %v75_v13, 0.0  ;;  %v194_v30 = vmax.f32 %v26_v18, 0.0  ;;  %v195_v31 = vmax.f32 %v27_v19, 0.0  ;;  %v76_v32 = vld [vmem:[%s3947_s1 + $0x1d0] sm:$0xff]  ;;  %v77_v33 = vld [vmem:[%s3947_s1 + $0x1d8] sm:$0xff]  ;;  %v46_v45 = vld [vmem:[%s3947_s1 + $0xe0] sm:$0xff] }
  0x10   :  { %2183 = vmatpush3.bf16.msra.mxu0 %v356_v1  ;;  %v366_v34 = vpack.c.bf16 %v211_v23, %v210_v17  ;;  %v226_v35 = vmax.f32 %v58_v20, 0.0  ;;  %v227_v36 = vmax.f32 %v59_v25, 0.0  ;;  %v212_v37 = vmax.f32 %v44_v26, 0.0  ;;  %v28_v38 = vld [vmem:[%s3947_s1 + $0x50] sm:$0xff]  ;;  %v29_v39 = vld [vmem:[%s3947_s1 + $0x58] sm:$0xff]  ;;  %v47_v46 = vld [vmem:[%s3947_s1 + $0xe8] sm:$0xff] }
  0x11   :  { %2247 = vmatpush3.bf16.msra.mxu1 %v372_v7  ;;  %2184 = vmatprep.subr.bf16.mxu0 %v365_v14  ;;  %v60_v40 = vld [vmem:[%s3947_s1 + $0x150] sm:$0xff]  ;;  %v382_v41 = vpack.c.bf16 %v243_v29, %v242_v24  ;;  %v213_v42 = vmax.f32 %v45_v27, 0.0  ;;  %v244_v43 = vmax.f32 %v76_v32, 0.0  ;;  %v61_v44 = vld [vmem:[%s3947_s1 + $0x158] sm:$0xff]  ;;  %v358_v47 = vpack.c.bf16 %v195_v31, %v194_v30  ;;  %v78_v49 = vld [vmem:[%s3947_s1 + $0x1e0] sm:$0xff] }
  0x12   :  { %2248 = vmatprep.subr.bf16.mxu1 %v381_v21  ;;  %v245_v48 = vmax.f32 %v77_v33, 0.0  ;;  %v79_v50 = vld [vmem:[%s3947_s1 + $0x1e8] sm:$0xff]  ;;  %v374_v51 = vpack.c.bf16 %v227_v36, %v226_v35  ;;  %v196_v53 = vmax.f32 %v28_v38, 0.0  ;;  %v197_v54 = vmax.f32 %v29_v39, 0.0  ;;  %v30_v55 = vld [vmem:[%s3947_s1 + $0x60] sm:$0xff]  ;;  %v48_v2 = vld [vmem:[%s3947_s1 + $0xf0] sm:$0xff] }
  0x13   :  { %v367_v52 = vpack.c.bf16 %v213_v42, %v212_v37  ;;  %v31_v56 = vld [vmem:[%s3947_s1 + $0x68] sm:$0xff]  ;;  %v228_v57 = vmax.f32 %v60_v40, 0.0  ;;  %v229_v58 = vmax.f32 %v61_v44, 0.0  ;;  %v214_v59 = vmax.f32 %v46_v45, 0.0  ;;  %v62_v61 = vld [vmem:[%s3947_s1 + $0x160] sm:$0xff]  ;;  %v49_v3 = vld [vmem:[%s3947_s1 + $0xf8] sm:$0xff] }
  0x14   :  { %2185 = vmatpush3.bf16.msra.mxu0 %v357_v22  ;;  %v215_v60 = vmax.f32 %v47_v46, 0.0  ;;  %v63_v62 = vld [vmem:[%s3947_s1 + $0x168] sm:$0xff]  ;;  %v383_v63 = vpack.c.bf16 %v245_v48, %v244_v43  ;;  %v246_v0 = vmax.f32 %v78_v49, 0.0  ;;  %v247_v1 = vmax.f32 %v79_v50, 0.0  ;;  %v80_v4 = vld [vmem:[%s3947_s1 + $0x1f0] sm:$0xff]  ;;  %v81_v7 = vld [vmem:[%s3947_s1 + $0x1f8] sm:$0xff] }
  0x15   :  { %2249 = vmatpush3.bf16.msra.mxu1 %v373_v28  ;;  %2186 = vmatprep.subr.bf16.mxu0 %v366_v34  ;;  %v198_v5 = vmax.f32 %v30_v55, 0.0  ;;  %v199_v6 = vmax.f32 %v31_v56, 0.0  ;;  %v359_v8 = vpack.c.bf16 %v197_v54, %v196_v53  ;;  %v230_v9 = vmax.f32 %v62_v61, 0.0  ;;  %v32_v11 = vld [vmem:[%s3947_s1 + $0x70] sm:$0xff]  ;;  %v33_v12 = vld [vmem:[%s3947_s1 + $0x78] sm:$0xff]  ;;  %v130_v25 = vld [vmem:[%s3947_s1 + $0x380] sm:$0xff] }
  0x16   :  { %2250 = vmatprep.subr.bf16.mxu1 %v382_v41  ;;  %v231_v10 = vmax.f32 %v63_v62, 0.0  ;;  %v2555_v13 = vld [vmem:[%s3948_s0 + $0x4] ss:$44 sps:$4 sm:$0xff]   ;;  %v375_v14 = vpack.c.bf16 %v229_v58, %v228_v57  ;;  %v368_v15 = vpack.c.bf16 %v215_v60, %v214_v59  ;;  %v216_v16 = vmax.f32 %v48_v2, 0.0  ;;  %v65_v22 = vld [vmem:[%s3947_s1 + $0x178] sm:$0xff]  ;;  %v131_v26 = vld [vmem:[%s3947_s1 + $0x388] sm:$0xff] }
  0x17   :  { %v217_v17 = vmax.f32 %v49_v3, 0.0  ;;  %v64_v18 = vld [vmem:[%s3947_s1 + $0x170] sm:$0xff]  ;;  %v384_v19 = vpack.c.bf16 %v247_v1, %v246_v0  ;;  %v248_v20 = vmax.f32 %v80_v4, 0.0  ;;  %v249_v21 = vmax.f32 %v81_v7, 0.0  ;;  %1031 = vmatprep.mubr.bf16.mxu0 %v2555_v13  ;;  %v2558_v23 = vld [vmem:[%s3948_s0 + $0xc] ss:$44 sps:$4 sm:$0xff]  }
  0x18   :  { %2187 = vmatpush3.bf16.msra.mxu0 %v358_v47  ;;  %v360_v24 = vpack.c.bf16 %v199_v6, %v198_v5  ;;  %v376_v27 = vpack.c.bf16 %v231_v10, %v230_v9  ;;  %v200_v28 = vmax.f32 %v32_v11, 0.0  ;;  %v201_v29 = vmax.f32 %v33_v12, 0.0  ;;  %1128 = vmatprep.mubr.bf16.mxu1 %v2558_v23  ;;  %v114_v31 = vld [vmem:[%s3947_s1 + $0x300] sm:$0xff]  ;;  %v99_v33 = vld [vmem:[%s3947_s1 + $0x288] sm:$0xff]  ;;  %v132_v47 = vld [vmem:[%s3947_s1 + $0x390] sm:$0xff] }
  0x19   :  { %2251 = vmatpush3.bf16.msra.mxu1 %v374_v51  ;;  %2188 = vmatprep.subr.bf16.mxu0 %v367_v52  ;;  %v232_v30 = vmax.f32 %v64_v18, 0.0  ;;  %v98_v32 = vld [vmem:[%s3947_s1 + $0x280] sm:$0xff]  ;;  %v369_v35 = vpack.c.bf16 %v217_v17, %v216_v16  ;;  %v233_v36 = vmax.f32 %v65_v22, 0.0  ;;  %v267_v38 = vmax.f32 %v99_v33, 0.0  ;;  %v83_v39 = vld [vmem:[%s3947_s1 + $0x208] sm:$0xff]  ;;  %v133_v48 = vld [vmem:[%s3947_s1 + $0x398] sm:$0xff] }
  0x1a   :  { %2252 = vmatprep.subr.bf16.mxu1 %v383_v63  ;;  %v82_v34 = vld [vmem:[%s3947_s1 + $0x200] sm:$0xff]  ;;  %v266_v37 = vmax.f32 %v98_v32, 0.0  ;;  %v385_v40 = vpack.c.bf16 %v249_v21, %v248_v20  ;;  %v298_v41 = vmax.f32 %v130_v25, 0.0  ;;  %v299_v42 = vmax.f32 %v131_v26, 0.0  ;;  %v115_v43 = vld [vmem:[%s3947_s1 + $0x308] sm:$0xff]  ;;  %v116_v49 = vld [vmem:[%s3947_s1 + $0x310] sm:$0xff] }
  0x1b   :  { %v361_v44 = vpack.c.bf16 %v201_v29, %v200_v28  ;;  %v250_v45 = vmax.f32 %v82_v34, 0.0  ;;  %v251_v46 = vmax.f32 %v83_v39, 0.0  ;;  %v377_v50 = vpack.c.bf16 %v233_v36, %v232_v30  ;;  %v2553_v51 = vld [vmem:[%s3948_s0] ss:$44 sps:$4 sm:$0xff]   ;;  %v117_v55 = vld [vmem:[%s3947_s1 + $0x318] sm:$0xff]  ;;  %v100_v56 = vld [vmem:[%s3947_s1 + $0x290] sm:$0xff] }
  0x1c   :  { %2189 = vmatpush3.bf16.msra.mxu0 %v359_v8  ;;  %v282_v52 = vmax.f32 %v114_v31, 0.0  ;;  %v283_v53 = vmax.f32 %v115_v43, 0.0  ;;  %v394_v54 = vpack.c.bf16 %v267_v38, %v266_v37  ;;  %v101_v57 = vld [vmem:[%s3947_s1 + $0x298] sm:$0xff]  ;;  %v410_v58 = vpack.c.bf16 %v299_v42, %v298_v41  ;;  %v84_v61 = vld [vmem:[%s3947_s1 + $0x210] sm:$0xff]  ;;  %v134_v10 = vld [vmem:[%s3947_s1 + $0x3a0] sm:$0xff] }
  0x1d   :  { %2253 = vmatpush3.bf16.msra.mxu1 %v375_v14  ;;  %2190 = vmatprep.subr.bf16.mxu0 %v368_v15  ;;  %v300_v59 = vmax.f32 %v132_v47, 0.0  ;;  %v301_v60 = vmax.f32 %v133_v48, 0.0  ;;  %v85_v62 = vld [vmem:[%s3947_s1 + $0x218] sm:$0xff]  ;;  %v2556_v63 = vld [vmem:[%s3948_s0 + $0x8] ss:$44 sps:$4 sm:$0xff]   ;;  %v268_v0 = vmax.f32 %v100_v56, 0.0  ;;  %v386_v2 = vpack.c.bf16 %v251_v46, %v250_v45 }
  0x1e   :  { %2254 = vmatprep.subr.bf16.mxu1 %v384_v19  ;;  %v269_v1 = vmax.f32 %v101_v57, 0.0  ;;  %v2559_v3 = vld [vmem:[%s3948_s0 + $0x5c] ss:$44 sps:$4 sm:$0xff]   ;;  %v252_v4 = vmax.f32 %v84_v61, 0.0  ;;  %v253_v5 = vmax.f32 %v85_v62, 0.0  ;;  %v402_v6 = vpack.c.bf16 %v283_v53, %v282_v52  ;;  %v118_v15 = vld [vmem:[%s3947_s1 + $0x320] sm:$0xff] }
  0x1f   :  { %v2561_v7 = vld [vmem:[%s3948_s0 + $0x64] ss:$44 sps:$4 sm:$0xff]   ;;  %v284_v8 = vmax.f32 %v116_v49, 0.0  ;;  %v285_v9 = vmax.f32 %v117_v55, 0.0  ;;  %v135_v11 = vld [vmem:[%s3947_s1 + $0x3a8] sm:$0xff]  ;;  %v411_v12 = vpack.c.bf16 %v301_v60, %v300_v59  ;;  %v302_v13 = vmax.f32 %v134_v10, 0.0 }
  0x20   :  { %2191 = vmatpush3.bf16.msra.mxu0 %v360_v24  ;;  %v303_v14 = vmax.f32 %v135_v11, 0.0  ;;  %v119_v16 = vld [vmem:[%s3947_s1 + $0x328] sm:$0xff]  ;;  %v102_v17 = vld [vmem:[%s3947_s1 + $0x2a0] sm:$0xff]  ;;  %v395_v18 = vpack.c.bf16 %v269_v1, %v268_v0  ;;  %v387_v23 = vpack.c.bf16 %v253_v5, %v252_v4  ;;  %v137_v37 = vld [vmem:[%s3947_s1 + $0x3b8] sm:$0xff] }
  0x21   :  { %2255 = vmatpush3.bf16.msra.mxu1 %v376_v27  ;;  %2192 = vmatprep.subr.bf16.mxu0 %v369_v35  ;;  %v103_v19 = vld [vmem:[%s3947_s1 + $0x2a8] sm:$0xff]  ;;  %v270_v20 = vmax.f32 %v102_v17, 0.0  ;;  %v86_v21 = vld [vmem:[%s3947_s1 + $0x220] sm:$0xff]  ;;  %v403_v26 = vpack.c.bf16 %v285_v9, %v284_v8  ;;  %v286_v27 = vmax.f32 %v118_v15, 0.0  ;;  %v287_v28 = vmax.f32 %v119_v16, 0.0  ;;  %v136_v35 = vld [vmem:[%s3947_s1 + $0x3b0] sm:$0xff] }
  0x22   :  { %2256 = vmatprep.subr.bf16.mxu1 %v385_v40  ;;  %v87_v22 = vld [vmem:[%s3947_s1 + $0x228] sm:$0xff]  ;;  %v271_v24 = vmax.f32 %v103_v19, 0.0  ;;  %v2563_v25 = vld [vmem:[%s3948_s0 + $0x58] ss:$44 sps:$4 sm:$0xff]   ;;  %v2565_v30 = vld [vmem:[%s3948_s0 + $0xb4] ss:$44 sps:$4 sm:$0xff]   ;;  %v412_v31 = vpack.c.bf16 %v303_v14, %v302_v13 }
  0x23   :  { %v2564_v29 = vld [vmem:[%s3948_s0 + $0x60] ss:$44 sps:$4 sm:$0xff]   ;;  %v254_v33 = vmax.f32 %v86_v21, 0.0  ;;  %v255_v34 = vmax.f32 %v87_v22, 0.0  ;;  %v2567_v36 = vld [vmem:[%s3948_s0 + $0xbc] ss:$44 sps:$4 sm:$0xff]   ;;  %v404_v46 = vpack.c.bf16 %v287_v28, %v286_v27 }
  0x24   :  { %2193 = vmatpush3.bf16.msra.mxu0 %v361_v44  ;;  %v396_v32 = vpack.c.bf16 %v271_v24, %v270_v20  ;;  %v304_v38 = vmax.f32 %v136_v35, 0.0  ;;  %v120_v39 = vld [vmem:[%s3947_s1 + $0x330] sm:$0xff]  ;;  %v121_v40 = vld [vmem:[%s3947_s1 + $0x338] sm:$0xff]  ;;  %v305_v41 = vmax.f32 %v137_v37, 0.0  ;;  %v138_v56 = vld [vmem:[%s3947_s1 + $0x3c0] sm:$0xff] }
  0x25   :  { %2257 = vmatpush3.bf16.msra.mxu1 %v377_v50  ;;  %2306 = vmatprep.subr.bf16.mxu0 %v394_v54  ;;  %v288_v42 = vmax.f32 %v120_v39, 0.0  ;;  %v104_v43 = vld [vmem:[%s3947_s1 + $0x2b0] sm:$0xff]  ;;  %v105_v44 = vld [vmem:[%s3947_s1 + $0x2b8] sm:$0xff]  ;;  %v289_v47 = vmax.f32 %v121_v40, 0.0  ;;  %v139_v57 = vld [vmem:[%s3947_s1 + $0x3c8] sm:$0xff]  ;;  %v306_v60 = vmax.f32 %v138_v56, 0.0 }
  0x26   :  { %2370 = vmatprep.subr.bf16.mxu1 %v410_v58  ;;  %v88_v45 = vld [vmem:[%s3947_s1 + $0x230] sm:$0xff]  ;;  %v272_v48 = vmax.f32 %v104_v43, 0.0  ;;  %v273_v49 = vmax.f32 %v105_v44, 0.0  ;;  %v89_v50 = vld [vmem:[%s3947_s1 + $0x238] sm:$0xff]  ;;  %v413_v52 = vpack.c.bf16 %v305_v41, %v304_v38  ;;  %v122_v58 = vld [vmem:[%s3947_s1 + $0x340] sm:$0xff]  ;;  %v307_v61 = vmax.f32 %v139_v57, 0.0 }
  0x27   :  { %1032 = vmatmul.mubr.bf16.vlgmr.msra.gmra.mrb[0].mxu0 %v2553_v51  ;;  %v388_v51 = vpack.c.bf16 %v255_v34, %v254_v33  ;;  %v256_v53 = vmax.f32 %v88_v45, 0.0  ;;  %v257_v54 = vmax.f32 %v89_v50, 0.0  ;;  %v405_v59 = vpack.c.bf16 %v289_v47, %v288_v42  ;;  %v123_v62 = vld [vmem:[%s3947_s1 + $0x348] sm:$0xff]  ;;  %v106_v0 = vld [vmem:[%s3947_s1 + $0x2c0] sm:$0xff]  ;;  %v2569_v8 = vld [vmem:[%s3948_s0 + $0xb0] ss:$44 sps:$4 sm:$0xff]  }
  0x28   :  { %1129 = vmatmul.mubr.bf16.vlgmr.msra.gmra.mrb[0].mxu1 %v2556_v63  ;;  %2307 = vmatpush3.bf16.msra.mxu0 %v386_v2  ;;  %v397_v55 = vpack.c.bf16 %v273_v49, %v272_v48  ;;  %v290_v63 = vmax.f32 %v122_v58, 0.0  ;;  %v107_v1 = vld [vmem:[%s3947_s1 + $0x2c8] sm:$0xff]  ;;  %v274_v4 = vmax.f32 %v106_v0, 0.0  ;;  %v414_v9 = vpack.c.bf16 %v307_v61, %v306_v60  ;;  %v2573_v15 = vld [vmem:[%s3948_s0 + $0x114] ss:$44 sps:$4 sm:$0xff]   ;;  %v109_v27 = vld [vmem:[%s3947_s1 + $0x2d8] sm:$0xff] }
  0x29   :  { %2371 = vmatpush3.bf16.msra.mxu1 %v402_v6  ;;  %1039 = vmatprep.mubr.bf16.mxu0 %v2559_v3  ;;  %v389_v2 = vpack.c.bf16 %v257_v54, %v256_v53  ;;  %v291_v3 = vmax.f32 %v123_v62, 0.0  ;;  %v275_v5 = vmax.f32 %v107_v1, 0.0  ;;  %v90_v6 = vld [vmem:[%s3947_s1 + $0x240] sm:$0xff]  ;;  %v2571_v13 = vld [vmem:[%s3948_s0 + $0x10c] ss:$44 sps:$4 sm:$0xff]   ;;  %v140_v17 = vld [vmem:[%s3947_s1 + $0x3d0] sm:$0xff] }
  0x2a   :  { %1136 = vmatprep.mubr.bf16.mxu1 %v2561_v7  ;;  %2372 = vmatprep.subr.bf16.mxu1 %v411_v12  ;;  %v91_v7 = vld [vmem:[%s3947_s1 + $0x248] sm:$0xff]  ;;  %v258_v10 = vmax.f32 %v90_v6, 0.0  ;;  %v2570_v12 = vld [vmem:[%s3948_s0 + $0xb8] ss:$44 sps:$4 sm:$0xff]   ;;  %v308_v20 = vmax.f32 %v140_v17, 0.0  ;;  %v124_v22 = vld [vmem:[%s3947_s1 + $0x350] sm:$0xff] }
  0x2b   :  { %2308 = vmatprep.subr.bf16.mxu0 %v395_v18  ;;  %v259_v11 = vmax.f32 %v91_v7, 0.0  ;;  %v398_v14 = vpack.c.bf16 %v275_v5, %v274_v4  ;;  %v406_v16 = vpack.c.bf16 %v291_v3, %v290_v63  ;;  %v141_v18 = vld [vmem:[%s3947_s1 + $0x3d8] sm:$0xff]  ;;  %v108_v24 = vld [vmem:[%s3947_s1 + $0x2d0] sm:$0xff]  ;;  %v142_v41 = vld [vmem:[%s3947_s1 + $0x3e0] sm:$0xff] }
  0x2c   :  { %2309 = vmatpush3.bf16.msra.mxu0 %v387_v23  ;;  %v309_v21 = vmax.f32 %v141_v18, 0.0  ;;  %v125_v23 = vld [vmem:[%s3947_s1 + $0x358] sm:$0xff]  ;;  %v276_v28 = vmax.f32 %v108_v24, 0.0  ;;  %v2575_v35 = vld [vmem:[%s3948_s0 + $0x108] ss:$44 sps:$4 sm:$0xff]   ;;  %v310_v44 = vmax.f32 %v142_v41, 0.0 }
  0x2d   :  { %2373 = vmatpush3.bf16.msra.mxu1 %v403_v26  ;;  %2310 = vmatprep.subr.bf16.mxu0 %v396_v32  ;;  %v390_v19 = vpack.c.bf16 %v259_v11, %v258_v10  ;;  %v293_v26 = vmax.f32 %v125_v23, 0.0  ;;  %v277_v32 = vmax.f32 %v109_v27, 0.0  ;;  %v2576_v37 = vld [vmem:[%s3948_s0 + $0x110] ss:$44 sps:$4 sm:$0xff]   ;;  %v2579_v42 = vld [vmem:[%s3948_s0 + $0x16c] ss:$44 sps:$4 sm:$0xff]  }
  0x2e   :  { %2374 = vmatprep.subr.bf16.mxu1 %v412_v31  ;;  %v415_v31 = vpack.c.bf16 %v309_v21, %v308_v20  ;;  %v2577_v38 = vld [vmem:[%s3948_s0 + $0x164] ss:$44 sps:$4 sm:$0xff]   ;;  %v143_v43 = vld [vmem:[%s3947_s1 + $0x3e8] sm:$0xff]  ;;  %v145_v63 = vld [vmem:[%s3947_s1 + $0x3f8] sm:$0xff] }
  0x2f   :  { %1040 = vmatmul.mubr.bf16.gmra.mrb[4].mxu0 %v2563_v25  ;;  %v292_v25 = vmax.f32 %v124_v22, 0.0  ;;  %v399_v39 = vpack.c.bf16 %v277_v32, %v276_v28  ;;  %v126_v45 = vld [vmem:[%s3947_s1 + $0x360] sm:$0xff]  ;;  %v311_v47 = vmax.f32 %v143_v43, 0.0  ;;  %v144_v62 = vld [vmem:[%s3947_s1 + $0x3f0] sm:$0xff]  ;;  %v129_v3 = vld [vmem:[%s3947_s1 + $0x378] sm:$0xff] }
  0x30   :  { %1137 = vmatmul.mubr.bf16.gmra.mrb[4].mxu1 %v2564_v29  ;;  %1047 = vmatprep.mubr.bf16.mxu0 %v2565_v30  ;;  %v92_v29 = vld [vmem:[%s3947_s1 + $0x250] sm:$0xff]  ;;  %v93_v30 = vld [vmem:[%s3947_s1 + $0x258] sm:$0xff]  ;;  %v294_v48 = vmax.f32 %v126_v45, 0.0  ;;  %v110_v50 = vld [vmem:[%s3947_s1 + $0x2e0] sm:$0xff]  ;;  %v312_v1 = vmax.f32 %v144_v62, 0.0  ;;  %v297_v7 = vmax.f32 %v129_v3, 0.0 }
  0x31   :  { %1144 = vmatprep.mubr.bf16.mxu1 %v2567_v36  ;;  %2375 = vmatpush3.bf16.msra.mxu1 %v404_v46  ;;  %v260_v33 = vmax.f32 %v92_v29, 0.0  ;;  %v261_v34 = vmax.f32 %v93_v30, 0.0  ;;  %v407_v36 = vpack.c.bf16 %v293_v26, %v292_v25  ;;  %v127_v46 = vld [vmem:[%s3947_s1 + $0x368] sm:$0xff]  ;;  %v278_v53 = vmax.f32 %v110_v50, 0.0  ;;  %v128_v0 = vld [vmem:[%s3947_s1 + $0x370] sm:$0xff]  ;;  %v113_v6 = vld [vmem:[%s3947_s1 + $0x2f8] sm:$0xff] }
  0x32   :  { %2311 = vmatpush3.bf16.msra.mxu0 %v388_v51  ;;  %2376 = vmatprep.subr.bf16.mxu1 %v413_v52  ;;  %v295_v49 = vmax.f32 %v127_v46, 0.0  ;;  %v111_v51 = vld [vmem:[%s3947_s1 + $0x2e8] sm:$0xff]  ;;  %v94_v52 = vld [vmem:[%s3947_s1 + $0x260] sm:$0xff]  ;;  %v416_v57 = vpack.c.bf16 %v311_v47, %v310_v44  ;;  %v296_v4 = vmax.f32 %v128_v0, 0.0  ;;  %v112_v5 = vld [vmem:[%s3947_s1 + $0x2f0] sm:$0xff] }
  0x33   :  { %2312 = vmatprep.subr.bf16.mxu0 %v397_v55  ;;  %v391_v40 = vpack.c.bf16 %v261_v34, %v260_v33  ;;  %v279_v54 = vmax.f32 %v111_v51, 0.0  ;;  %v95_v55 = vld [vmem:[%s3947_s1 + $0x268] sm:$0xff]  ;;  %v262_v56 = vmax.f32 %v94_v52, 0.0  ;;  %v96_v10 = vld [vmem:[%s3947_s1 + $0x270] sm:$0xff]  ;;  %v97_v11 = vld [vmem:[%s3947_s1 + $0x278] sm:$0xff] }
  0x34   :  { %v408_v58 = vpack.c.bf16 %v295_v49, %v294_v48  ;;  %v2583_v17 = vld [vmem:[%s3948_s0 + $0x1bc] ss:$44 sps:$4 sm:$0xff]   ;;  %v409_v18 = vpack.c.bf16 %v297_v7, %v296_v4  ;;  %v2585_v20 = vld [vmem:[%s3948_s0 + $0x1c4] ss:$44 sps:$4 sm:$0xff]   ;;  %v2588_v28 = vld [vmem:[%s3948_s0 + $0x1c0] ss:$44 sps:$4 sm:$0xff]  }
  0x35   :  { %2377 = vmatpush3.bf16.msra.mxu1 %v405_v59  ;;  %v263_v59 = vmax.f32 %v95_v55, 0.0  ;;  %v400_v60 = vpack.c.bf16 %v279_v54, %v278_v53  ;;  %v162_v22 = vld [vmem:[%s3947_s1 + $0x480] sm:$0xff]  ;;  %v163_v23 = vld [vmem:[%s3947_s1 + $0x488] sm:$0xff]  ;;  %v164_v41 = vld [vmem:[%s3947_s1 + $0x490] sm:$0xff] }
  0x36   :  { %2313 = vmatpush3.bf16.msra.mxu0 %v389_v2  ;;  %2378 = vmatprep.subr.bf16.mxu1 %v414_v9  ;;  %v313_v2 = vmax.f32 %v145_v63, 0.0  ;;  %v281_v9 = vmax.f32 %v113_v6, 0.0  ;;  %v330_v24 = vmax.f32 %v162_v22, 0.0  ;;  %v331_v25 = vmax.f32 %v163_v23, 0.0  ;;  %v2587_v27 = vld [vmem:[%s3948_s0 + $0x1b8] ss:$44 sps:$4 sm:$0xff]  }
  0x37   :  { %1048 = vmatmul.mubr.bf16.gmra.mrb[8].mxu0 %v2569_v8  ;;  %2314 = vmatprep.subr.bf16.mxu0 %v398_v14  ;;  %v392_v61 = vpack.c.bf16 %v263_v59, %v262_v56  ;;  %v280_v8 = vmax.f32 %v112_v5, 0.0  ;;  %v264_v14 = vmax.f32 %v96_v10, 0.0  ;;  %v2589_v29 = vld [vmem:[%s3948_s0 + $0x214] ss:$44 sps:$4 sm:$0xff]   ;;  %v2591_v30 = vld [vmem:[%s3948_s0 + $0x21c] ss:$44 sps:$4 sm:$0xff]  }
  0x38   :  { %1145 = vmatmul.mubr.bf16.gmra.mrb[8].mxu1 %v2570_v12  ;;  %1055 = vmatprep.mubr.bf16.mxu0 %v2571_v13  ;;  %v2581_v12 = vld [vmem:[%s3948_s0 + $0x160] ss:$44 sps:$4 sm:$0xff]   ;;  %v417_v13 = vpack.c.bf16 %v313_v2, %v312_v1  ;;  %v426_v26 = vpack.c.bf16 %v331_v25, %v330_v24  ;;  %v2594_v32 = vld [vmem:[%s3948_s0 + $0x218] ss:$44 sps:$4 sm:$0xff]   ;;  %v2601_v45 = vld [vmem:[%s3948_s0 + $0x10] ss:$44 sps:$4 sm:$0xff]  }
  0x39   :  { %1152 = vmatprep.mubr.bf16.mxu1 %v2573_v15  ;;  %2379 = vmatpush3.bf16.msra.mxu1 %v406_v16  ;;  %v265_v15 = vmax.f32 %v97_v11, 0.0  ;;  %v2582_v16 = vld [vmem:[%s3948_s0 + $0x168] ss:$44 sps:$4 sm:$0xff]   ;;  %v2595_v33 = vld [vmem:[%s3948_s0 + $0x26c] ss:$44 sps:$4 sm:$0xff]   ;;  %v332_v48 = vmax.f32 %v164_v41, 0.0 }
  0x3a   :  { %2315 = vmatpush3.bf16.msra.mxu0 %v390_v19  ;;  %2380 = vmatprep.subr.bf16.mxu1 %v415_v31  ;;  %v401_v19 = vpack.c.bf16 %v281_v9, %v280_v8  ;;  %v2593_v31 = vld [vmem:[%s3948_s0 + $0x210] ss:$44 sps:$4 sm:$0xff]   ;;  %v2597_v34 = vld [vmem:[%s3948_s0 + $0x274] ss:$44 sps:$4 sm:$0xff]   ;;  %v167_v51 = vld [vmem:[%s3947_s1 + $0x4a8] sm:$0xff] }
  0x3b   :  { %2316 = vmatprep.subr.bf16.mxu0 %v399_v39  ;;  %v393_v21 = vpack.c.bf16 %v265_v15, %v264_v14  ;;  %v146_v39 = vld [vmem:[%s3947_s1 + $0x400] sm:$0xff]  ;;  %v148_v46 = vld [vmem:[%s3947_s1 + $0x410] sm:$0xff]  ;;  %v149_v47 = vld [vmem:[%s3947_s1 + $0x418] sm:$0xff]  ;;  %v335_v59 = vmax.f32 %v167_v51, 0.0 }
  0x3c   :  { %v314_v43 = vmax.f32 %v146_v39, 0.0  ;;  %v166_v50 = vld [vmem:[%s3947_s1 + $0x4a0] sm:$0xff]  ;;  %v2607_v54 = vld [vmem:[%s3948_s0 + $0x6c] ss:$44 sps:$4 sm:$0xff]   ;;  %v316_v55 = vmax.f32 %v148_v46, 0.0  ;;  %v317_v56 = vmax.f32 %v149_v47, 0.0 }
  0x3d   :  { %2381 = vmatpush3.bf16.msra.mxu1 %v407_v36  ;;  %v2600_v36 = vld [vmem:[%s3948_s0 + $0x270] ss:$44 sps:$4 sm:$0xff]   ;;  %v2604_v52 = vld [vmem:[%s3948_s0 + $0x18] ss:$44 sps:$4 sm:$0xff]   ;;  %v151_v62 = vld [vmem:[%s3947_s1 + $0x428] sm:$0xff] }
  0x3e   :  { %2317 = vmatpush3.bf16.msra.mxu0 %v391_v40  ;;  %2382 = vmatprep.subr.bf16.mxu1 %v416_v57  ;;  %v147_v40 = vld [vmem:[%s3947_s1 + $0x408] sm:$0xff]  ;;  %v2609_v57 = vld [vmem:[%s3948_s0 + $0x74] ss:$44 sps:$4 sm:$0xff]   ;;  %v169_v0 = vld [vmem:[%s3947_s1 + $0x4b8] sm:$0xff]  ;;  %v419_v1 = vpack.c.bf16 %v317_v56, %v316_v55  ;;  %v319_v5 = vmax.f32 %v151_v62, 0.0 }
  0x3f   :  { %1056 = vmatmul.mubr.bf16.gmra.mrb[12].mxu0 %v2575_v35  ;;  %2318 = vmatprep.subr.bf16.mxu0 %v400_v60  ;;  %v2599_v35 = vld [vmem:[%s3948_s0 + $0x268] ss:$44 sps:$4 sm:$0xff]   ;;  %v315_v44 = vmax.f32 %v147_v40, 0.0  ;;  %v150_v60 = vld [vmem:[%s3947_s1 + $0x420] sm:$0xff]  ;;  %v2612_v7 = vld [vmem:[%s3948_s0 + $0x70] ss:$44 sps:$4 sm:$0xff]  }
  0x40   :  { %1153 = vmatmul.mubr.bf16.gmra.mrb[12].mxu1 %v2576_v37  ;;  %1063 = vmatprep.mubr.bf16.mxu0 %v2577_v38  ;;  %v2603_v37 = vld [vmem:[%s3948_s0 + $0x14] ss:$44 sps:$4 sm:$0xff]   ;;  %v2606_v38 = vld [vmem:[%s3948_s0 + $0x1c] ss:$44 sps:$4 sm:$0xff]   ;;  %v318_v4 = vmax.f32 %v150_v60, 0.0  ;;  %v337_v10 = vmax.f32 %v169_v0, 0.0 }
  0x41   :  { %1160 = vmatprep.mubr.bf16.mxu1 %v2579_v42  ;;  %2383 = vmatpush3.bf16.msra.mxu1 %v408_v58  ;;  %v165_v42 = vld [vmem:[%s3947_s1 + $0x498] sm:$0xff]  ;;  %v418_v53 = vpack.c.bf16 %v315_v44, %v314_v43  ;;  %v334_v58 = vmax.f32 %v166_v50, 0.0  ;;  %v168_v63 = vld [vmem:[%s3947_s1 + $0x4b0] sm:$0xff]  ;;  %v171_v14 = vld [vmem:[%s3947_s1 + $0x4c8] sm:$0xff] }
  0x42   :  { %2319 = vmatpush3.bf16.msra.mxu0 %v392_v61  ;;  %2384 = vmatprep.subr.bf16.mxu1 %v417_v13  ;;  %v333_v49 = vmax.f32 %v165_v42, 0.0  ;;  %v2611_v2 = vld [vmem:[%s3948_s0 + $0x68] ss:$44 sps:$4 sm:$0xff]   ;;  %v2613_v8 = vld [vmem:[%s3948_s0 + $0xc4] ss:$44 sps:$4 sm:$0xff]   ;;  %v336_v9 = vmax.f32 %v168_v63, 0.0 }
  0x43   :  { %2320 = vmatprep.subr.bf16.mxu0 %v401_v19  ;;  %v428_v3 = vpack.c.bf16 %v335_v59, %v334_v58  ;;  %v152_v6 = vld [vmem:[%s3947_s1 + $0x430] sm:$0xff]  ;;  %v153_v11 = vld [vmem:[%s3947_s1 + $0x438] sm:$0xff]  ;;  %v155_v22 = vld [vmem:[%s3947_s1 + $0x448] sm:$0xff] }
  0x44   :  { %v427_v61 = vpack.c.bf16 %v333_v49, %v332_v48  ;;  %v2615_v13 = vld [vmem:[%s3948_s0 + $0xcc] ss:$44 sps:$4 sm:$0xff]   ;;  %v320_v15 = vmax.f32 %v152_v6, 0.0  ;;  %v429_v19 = vpack.c.bf16 %v337_v10, %v336_v9  ;;  %v172_v23 = vld [vmem:[%s3947_s1 + $0x4d0] sm:$0xff]  ;;  %v158_v42 = vld [vmem:[%s3947_s1 + $0x460] sm:$0xff] }
  0x45   :  { %2385 = vmatpush3.bf16.msra.mxu1 %v409_v18  ;;  %v154_v18 = vld [vmem:[%s3947_s1 + $0x440] sm:$0xff]  ;;  %v173_v24 = vld [vmem:[%s3947_s1 + $0x4d8] sm:$0xff]  ;;  %v159_v46 = vld [vmem:[%s3947_s1 + $0x468] sm:$0xff]  ;;  %v326_v50 = vmax.f32 %v158_v42, 0.0 }
  0x46   :  { %2321 = vmatpush3.bf16.msra.mxu0 %v393_v21  ;;  %2534 = vmatprep.subr.bf16.mxu1 %v426_v26  ;;  %v339_v21 = vmax.f32 %v171_v14, 0.0  ;;  %v2617_v25 = vld [vmem:[%s3948_s0 + $0xc0] ss:$44 sps:$4 sm:$0xff]   ;;  %v176_v47 = vld [vmem:[%s3947_s1 + $0x4f0] sm:$0xff]  ;;  %v177_v48 = vld [vmem:[%s3947_s1 + $0x4f8] sm:$0xff]  ;;  %v327_v51 = vmax.f32 %v159_v46, 0.0 }
  0x47   :  { %1064 = vmatmul.mubr.bf16.gmra.mrb[16].mxu0 %v2581_v12  ;;  %2434 = vmatprep.subr.bf16.mxu0 %v426_v26  ;;  %v170_v12 = vld [vmem:[%s3947_s1 + $0x4c0] sm:$0xff]  ;;  %v160_v55 = vld [vmem:[%s3947_s1 + $0x470] sm:$0xff]  ;;  %v161_v56 = vld [vmem:[%s3947_s1 + $0x478] sm:$0xff] }
  0x48   :  { %1161 = vmatmul.mubr.bf16.gmra.mrb[16].mxu1 %v2582_v16  ;;  %1071 = vmatprep.mubr.bf16.mxu0 %v2583_v17  ;;  %v420_v16 = vpack.c.bf16 %v319_v5, %v318_v4  ;;  %v321_v17 = vmax.f32 %v153_v11, 0.0  ;;  %v178_v58 = vld [vmem:[%s3947_s1 + $0x500] sm:$0xff]  ;;  %v179_v59 = vld [vmem:[%s3947_s1 + $0x508] sm:$0xff]  ;;  %v424_v63 = vpack.c.bf16 %v327_v51, %v326_v50  ;;  %v328_v0 = vmax.f32 %v160_v55, 0.0  ;;  %v2664_v46 = vld [vmem:[%s3948_s0 + $0xd0] ss:$44 sps:$4 sm:$0xff]  }
  0x49   :  { %1168 = vmatprep.mubr.bf16.mxu1 %v2585_v20  ;;  %v338_v20 = vmax.f32 %v170_v12, 0.0  ;;  %v2624_v60 = vld [vmem:[%s3948_s0 + $0x120] ss:$44 sps:$4 sm:$0xff]   ;;  %v2627_v62 = vld [vmem:[%s3948_s0 + $0x17c] ss:$44 sps:$4 sm:$0xff]   ;;  %v347_v4 = vmax.f32 %v179_v59, 0.0 }
  0x4a   :  { %v421_v26 = vpack.c.bf16 %v321_v17, %v320_v15  ;;  %v2631_v9 = vld [vmem:[%s3948_s0 + $0x1cc] ss:$44 sps:$4 sm:$0xff]   ;;  %v2633_v10 = vld [vmem:[%s3948_s0 + $0x1d4] ss:$44 sps:$4 sm:$0xff]   ;;  %v2636_v12 = vld [vmem:[%s3948_s0 + $0x1d0] ss:$44 sps:$4 sm:$0xff]  }
  0x4b   :  { %v2635_v11 = vld [vmem:[%s3948_s0 + $0x1c8] ss:$44 sps:$4 sm:$0xff]   ;;  %v2639_v14 = vld [vmem:[%s3948_s0 + $0x22c] ss:$44 sps:$4 sm:$0xff]   ;;  %v2670_v51 = vld [vmem:[%s3948_s0 + $0x130] ss:$44 sps:$4 sm:$0xff]  }
  0x4c   :  { %v2641_v15 = vld [vmem:[%s3948_s0 + $0x220] ss:$44 sps:$4 sm:$0xff]   ;;  %v2643_v17 = vld [vmem:[%s3948_s0 + $0x27c] ss:$44 sps:$4 sm:$0xff]  }
  0x4d   :  { %v2660_v42 = vld [vmem:[%s3948_s0 + $0x288] ss:$44 sps:$4 sm:$0xff]   ;;  %v2675_v55 = vld [vmem:[%s3948_s0 + $0x1e0] ss:$44 sps:$4 sm:$0xff]   ;;  %v2680_v59 = vld [vmem:[%s3948_s0 + $0x290] ss:$44 sps:$4 sm:$0xff]  }
  0x4e   :  { %v2669_v50 = vld [vmem:[%s3948_s0 + $0x128] ss:$44 sps:$4 sm:$0xff]  }
  0x4f   :  { %1072 = vmatmul.mubr.bf16.gmra.mrb[20].mxu0 %v2587_v27  ;;  %v322_v27 = vmax.f32 %v154_v18, 0.0  ;;  %v2645_v18 = vld [vmem:[%s3948_s0 + $0x284] ss:$44 sps:$4 sm:$0xff]  }
  0x50   :  { %1169 = vmatmul.mubr.bf16.gmra.mrb[20].mxu1 %v2588_v28  ;;  %1079 = vmatprep.mubr.bf16.mxu0 %v2589_v29  ;;  %v323_v28 = vmax.f32 %v155_v22, 0.0  ;;  %v340_v29 = vmax.f32 %v172_v23, 0.0  ;;  %v2654_v22 = vld [vmem:[%s3948_s0 + $0x234] ss:$44 sps:$4 sm:$0xff]  }
  0x51   :  { %1176 = vmatprep.mubr.bf16.mxu1 %v2591_v30  ;;  %v156_v30 = vld [vmem:[%s3947_s1 + $0x450] sm:$0xff] }
  0x52   :  { %v422_v39 = vpack.c.bf16 %v323_v28, %v322_v27  ;;  %v324_v40 = vmax.f32 %v156_v30, 0.0  ;;  %v180_v23 = vld [vmem:[%s3947_s1 + $0x510] sm:$0xff]  ;;  %v2649_v27 = vld [vmem:[%s3948_s0 + $0x20] ss:$44 sps:$4 sm:$0xff]  }
  0x53   :  { %v182_v28 = vld [vmem:[%s3947_s1 + $0x520] sm:$0xff]  ;;  %v2652_v30 = vld [vmem:[%s3948_s0 + $0x230] ss:$44 sps:$4 sm:$0xff]  }
  0x57   :  { %1080 = vmatmul.mubr.bf16.gmra.mrb[24].mxu0 %v2593_v31  ;;  %v2618_v31 = vld [vmem:[%s3948_s0 + $0xc8] ss:$44 sps:$4 sm:$0xff]  }
  0x58   :  { %1177 = vmatmul.mubr.bf16.gmra.mrb[24].mxu1 %v2594_v32  ;;  %1087 = vmatprep.mubr.bf16.mxu0 %v2595_v33  ;;  %v2619_v32 = vld [vmem:[%s3948_s0 + $0x11c] ss:$44 sps:$4 sm:$0xff]   ;;  %v430_v33 = vpack.c.bf16 %v339_v21, %v338_v20  ;;  %v2648_v20 = vld [vmem:[%s3948_s0 + $0x280] ss:$44 sps:$4 sm:$0xff]   ;;  %v2651_v21 = vld [vmem:[%s3948_s0 + $0x24] ss:$44 sps:$4 sm:$0xff]  }
  0x59   :  { %1184 = vmatprep.mubr.bf16.mxu1 %v2597_v34  ;;  %v341_v34 = vmax.f32 %v173_v24, 0.0  ;;  %v181_v24 = vld [vmem:[%s3947_s1 + $0x518] sm:$0xff] }
  0x5b   :  { %v431_v43 = vpack.c.bf16 %v341_v34, %v340_v29  ;;  %v183_v29 = vld [vmem:[%s3947_s1 + $0x528] sm:$0xff]  ;;  %v350_v34 = vmax.f32 %v182_v28, 0.0 }
  0x5f   :  { %1088 = vmatmul.mubr.bf16.gmra.mrb[28].mxu0 %v2599_v35  ;;  %v157_v35 = vld [vmem:[%s3947_s1 + $0x458] sm:$0xff] }
  0x60   :  { %1185 = vmatmul.mubr.bf16.gmra.mrb[28].mxu1 %v2600_v36  ;;  %1225 = vmatprep.mubr.bf16.mxu0 %v2603_v37  ;;  %v174_v36 = vld [vmem:[%s3947_s1 + $0x4e0] sm:$0xff]  ;;  %v175_v37 = vld [vmem:[%s3947_s1 + $0x4e8] sm:$0xff]  ;;  %v325_v41 = vmax.f32 %v157_v35, 0.0  ;;  %v351_v35 = vmax.f32 %v183_v29, 0.0 }
  0x61   :  { %1322 = vmatprep.mubr.bf16.mxu1 %v2606_v38  ;;  %v2621_v38 = vld [vmem:[%s3948_s0 + $0x124] ss:$44 sps:$4 sm:$0xff]   ;;  %v342_v44 = vmax.f32 %v174_v36, 0.0 }
  0x62   :  { %v423_v49 = vpack.c.bf16 %v325_v41, %v324_v40  ;;  %v184_v36 = vld [vmem:[%s3947_s1 + $0x530] sm:$0xff]  ;;  %v2659_v41 = vld [vmem:[%s3948_s0 + $0x78] ss:$44 sps:$4 sm:$0xff]  }
  0x67   :  { %1226 = vmatmul.mubr.bf16.vlgmr.msra.gmra.mrb[32].mxu0 %v2601_v45  ;;  %v343_v45 = vmax.f32 %v175_v37, 0.0  ;;  %v185_v37 = vld [vmem:[%s3947_s1 + $0x538] sm:$0xff] }
  0x68   :  { %1323 = vmatmul.mubr.bf16.vlgmr.msra.gmra.mrb[32].mxu1 %v2604_v52  ;;  %2435 = vmatpush3.bf16.msra.mxu0 %v418_v53  ;;  %v353_v40 = vmax.f32 %v185_v37, 0.0 }
  0x69   :  { %2542 = vmatpush3.bf16.msra.mxu1 %v418_v53  ;;  %1233 = vmatprep.mubr.bf16.mxu0 %v2607_v54  ;;  %v432_v52 = vpack.c.bf16 %v343_v45, %v342_v44  ;;  %v344_v53 = vmax.f32 %v176_v47, 0.0  ;;  %v345_v54 = vmax.f32 %v177_v48, 0.0  ;;  %v2663_v44 = vld [vmem:[%s3948_s0 + $0x28] ss:$44 sps:$4 sm:$0xff]   ;;  %v2665_v47 = vld [vmem:[%s3948_s0 + $0x80] ss:$44 sps:$4 sm:$0xff]  }
  0x6a   :  { %1330 = vmatprep.mubr.bf16.mxu1 %v2609_v57  ;;  %2535 = vmatprep.subr.bf16.mxu1 %v427_v61  ;;  %v2623_v57 = vld [vmem:[%s3948_s0 + $0x118] ss:$44 sps:$4 sm:$0xff]  }
  0x6b   :  { %2436 = vmatprep.subr.bf16.mxu0 %v427_v61  ;;  %v2625_v61 = vld [vmem:[%s3948_s0 + $0x174] ss:$44 sps:$4 sm:$0xff]   ;;  %v2666_v48 = vld [vmem:[%s3948_s0 + $0x12c] ss:$44 sps:$4 sm:$0xff]  }
  0x6c   :  { %2437 = vmatpush3.bf16.msra.mxu0 %v419_v1 }
  0x6d   :  { %2543 = vmatpush3.bf16.msra.mxu1 %v419_v1  ;;  %2438 = vmatprep.subr.bf16.mxu0 %v428_v3  ;;  %v329_v1 = vmax.f32 %v161_v56, 0.0  ;;  %v2676_v56 = vld [vmem:[%s3948_s0 + $0x1dc] ss:$44 sps:$4 sm:$0xff]  }
  0x6e   :  { %2536 = vmatprep.subr.bf16.mxu1 %v428_v3  ;;  %v346_v3 = vmax.f32 %v178_v58, 0.0  ;;  %v2679_v58 = vld [vmem:[%s3948_s0 + $0x1d8] ss:$44 sps:$4 sm:$0xff]  }
  0x6f   :  { %1234 = vmatmul.mubr.bf16.gmra.mrb[36].mxu0 %v2611_v2  ;;  %v433_v2 = vpack.c.bf16 %v345_v54, %v344_v53  ;;  %v425_v5 = vpack.c.bf16 %v329_v1, %v328_v0  ;;  %v2673_v53 = vld [vmem:[%s3948_s0 + $0x188] ss:$44 sps:$4 sm:$0xff]   ;;  %v2674_v54 = vld [vmem:[%s3948_s0 + $0x180] ss:$44 sps:$4 sm:$0xff]  }
  0x70   :  { %1331 = vmatmul.mubr.bf16.gmra.mrb[36].mxu1 %v2612_v7  ;;  %1241 = vmatprep.mubr.bf16.mxu0 %v2613_v8  ;;  %v434_v6 = vpack.c.bf16 %v347_v4, %v346_v3  ;;  %v2629_v7 = vld [vmem:[%s3948_s0 + $0x170] ss:$44 sps:$4 sm:$0xff]   ;;  %v2630_v8 = vld [vmem:[%s3948_s0 + $0x178] ss:$44 sps:$4 sm:$0xff]  }
  0x71   :  { %1338 = vmatprep.mubr.bf16.mxu1 %v2615_v13  ;;  %2544 = vmatpush3.bf16.msra.mxu1 %v420_v16  ;;  %v2637_v13 = vld [vmem:[%s3948_s0 + $0x224] ss:$44 sps:$4 sm:$0xff]  }
  0x72   :  { %2439 = vmatpush3.bf16.msra.mxu0 %v420_v16  ;;  %2537 = vmatprep.subr.bf16.mxu1 %v429_v19  ;;  %v2642_v16 = vld [vmem:[%s3948_s0 + $0x228] ss:$44 sps:$4 sm:$0xff]  }
  0x73   :  { %2440 = vmatprep.subr.bf16.mxu0 %v429_v19  ;;  %v2647_v19 = vld [vmem:[%s3948_s0 + $0x278] ss:$44 sps:$4 sm:$0xff]  }
  0x75   :  { %2545 = vmatpush3.bf16.msra.mxu1 %v421_v26 }
  0x76   :  { %2441 = vmatpush3.bf16.msra.mxu0 %v421_v26  ;;  %2538 = vmatprep.subr.bf16.mxu1 %v430_v33  ;;  %v349_v26 = vmax.f32 %v181_v24, 0.0 }
  0x77   :  { %1242 = vmatmul.mubr.bf16.gmra.mrb[40].mxu0 %v2617_v25  ;;  %2442 = vmatprep.subr.bf16.mxu0 %v430_v33  ;;  %v348_v25 = vmax.f32 %v180_v23, 0.0 }
  0x78   :  { %1339 = vmatmul.mubr.bf16.gmra.mrb[40].mxu1 %v2618_v31  ;;  %1249 = vmatprep.mubr.bf16.mxu0 %v2619_v32  ;;  %v2655_v31 = vld [vmem:[%s3948_s0 + $0x7c] ss:$44 sps:$4 sm:$0xff]   ;;  %v2657_v32 = vld [vmem:[%s3948_s0 + $0x28c] ss:$44 sps:$4 sm:$0xff]  }
  0x79   :  { %1346 = vmatprep.mubr.bf16.mxu1 %v2621_v38  ;;  %2546 = vmatpush3.bf16.msra.mxu1 %v422_v39  ;;  %v435_v33 = vpack.c.bf16 %v349_v26, %v348_v25  ;;  %v436_v38 = vpack.c.bf16 %v351_v35, %v350_v34 }
  0x7a   :  { %2443 = vmatpush3.bf16.msra.mxu0 %v422_v39  ;;  %2539 = vmatprep.subr.bf16.mxu1 %v431_v43  ;;  %v352_v39 = vmax.f32 %v184_v36, 0.0 }
  0x7b   :  { %2444 = vmatprep.subr.bf16.mxu0 %v431_v43  ;;  %v2661_v43 = vld [vmem:[%s3948_s0 + $0xd4] ss:$44 sps:$4 sm:$0xff]  }
  0x7c   :  { %v437_v45 = vpack.c.bf16 %v353_v40, %v352_v39 }
  0x7d   :  { %2547 = vmatpush3.bf16.msra.mxu1 %v423_v49 }
  0x7e   :  { %2445 = vmatpush3.bf16.msra.mxu0 %v423_v49  ;;  %2540 = vmatprep.subr.bf16.mxu1 %v432_v52  ;;  %v2668_v49 = vld [vmem:[%s3948_s0 + $0xd8] ss:$44 sps:$4 sm:$0xff]  }
  0x7f   :  { %1250 = vmatmul.mubr.bf16.gmra.mrb[44].mxu0 %v2623_v57  ;;  %2446 = vmatprep.subr.bf16.mxu0 %v432_v52  ;;  %v2671_v52 = vld [vmem:[%s3948_s0 + $0x184] ss:$44 sps:$4 sm:$0xff]  }
  0x80   :  { %1347 = vmatmul.mubr.bf16.gmra.mrb[44].mxu1 %v2624_v60  ;;  %1257 = vmatprep.mubr.bf16.mxu0 %v2625_v61  ;;  %v2678_v57 = vld [vmem:[%s3948_s0 + $0x238] ss:$44 sps:$4 sm:$0xff]  }
  0x81   :  { %1354 = vmatprep.mubr.bf16.mxu1 %v2627_v62  ;;  %2548 = vmatpush3.bf16.msra.mxu1 %v424_v63 }
  0x82   :  { %2447 = vmatpush3.bf16.msra.mxu0 %v424_v63  ;;  %2541 = vmatprep.subr.bf16.mxu1 %v433_v2 }
  0x83   :  { %2448 = vmatprep.subr.bf16.mxu0 %v433_v2 }
  0x85   :  { %2549 = vmatpush3.bf16.msra.mxu1 %v425_v5 }
  0x86   :  { %2449 = vmatpush3.bf16.msra.mxu0 %v425_v5  ;;  %2510 = vmatprep.subr.bf16.mxu1 %v434_v6 }
  0x87   :  { %1258 = vmatmul.mubr.bf16.gmra.mrb[48].mxu0 %v2629_v7 }
  0x88   :  { %1355 = vmatmul.mubr.bf16.gmra.mrb[48].mxu1 %v2630_v8  ;;  %1265 = vmatprep.mubr.bf16.mxu0 %v2631_v9 }
  0x89   :  { %1362 = vmatprep.mubr.bf16.mxu1 %v2633_v10 }
  0x8f   :  { %1266 = vmatmul.mubr.bf16.gmra.mrb[52].mxu0 %v2635_v11 }
  0x90   :  { %1363 = vmatmul.mubr.bf16.gmra.mrb[52].mxu1 %v2636_v12  ;;  %1273 = vmatprep.mubr.bf16.mxu0 %v2637_v13 }
  0x91   :  { %1370 = vmatprep.mubr.bf16.mxu1 %v2639_v14 }
  0x97   :  { %1274 = vmatmul.mubr.bf16.gmra.mrb[56].mxu0 %v2641_v15 }
  0x98   :  { %1371 = vmatmul.mubr.bf16.gmra.mrb[56].mxu1 %v2642_v16  ;;  %1281 = vmatprep.mubr.bf16.mxu0 %v2643_v17 }
  0x99   :  { %1378 = vmatprep.mubr.bf16.mxu1 %v2645_v18 }
  0x9f   :  { %1282 = vmatmul.mubr.bf16.gmra.mrb[60].mxu0 %v2647_v19 }
  0xa0   :  { %1379 = vmatmul.mubr.bf16.gmra.mrb[60].mxu1 %v2648_v20  ;;  %1419 = vmatprep.mubr.bf16.mxu0 %v2651_v21 }
  0xa1   :  { %1467 = vmatprep.mubr.bf16.mxu1 %v2654_v22 }
  0xa7   :  { %1420 = vmatmul.mubr.bf16.vlgmr.msra.gmra.mrb[64].mxu0 %v2649_v27 }
  0xa8   :  { %1468 = vmatmul.mubr.bf16.vlgmr.msra.gmra.mrb[64].mxu1 %v2652_v30  ;;  %1427 = vmatprep.mubr.bf16.mxu0 %v2655_v31 }
  0xa9   :  { %2511 = vmatpush3.bf16.msra.mxu1 %v434_v6  ;;  %1475 = vmatprep.mubr.bf16.mxu1 %v2657_v32 }
  0xaa   :  { %2512 = vmatprep.subr.bf16.mxu1 %v435_v33 }
  0xad   :  { %2513 = vmatpush3.bf16.msra.mxu1 %v435_v33 }
  0xae   :  { %2514 = vmatprep.subr.bf16.mxu1 %v436_v38 }
  0xaf   :  { %1428 = vmatmul.mubr.bf16.gmra.mrb[68].mxu0 %v2659_v41 }
  0xb0   :  { %1476 = vmatmul.mubr.bf16.gmra.mrb[68].mxu1 %v2660_v42  ;;  %1435 = vmatprep.mubr.bf16.mxu0 %v2661_v43 }
  0xb1   :  { %2515 = vmatpush3.bf16.msra.mxu1 %v436_v38  ;;  %2518 = vmatprep.mubr.msk.bf16.mxu1 %vm974_vm0, %v2663_v44 }
  0xb2   :  { %2516 = vmatprep.subr.bf16.mxu1 %v437_v45 }
  0xb5   :  { %2517 = vmatpush3.bf16.msra.mxu1 %v437_v45 }
  0xb7   :  { %1436 = vmatmul.mubr.bf16.gmra.mrb[72].mxu0 %v2664_v46 }
  0xb8   :  { %2519 = vmatmul.mubr.msk.bf16.vlgmr.msra.gmra.mrb[72].mxu1 %vm974_vm0, %v2665_v47  ;;  %1443 = vmatprep.mubr.bf16.mxu0 %v2666_v48 }
  0xb9   :  { %2522 = vmatprep.mubr.msk.bf16.mxu1 %vm974_vm0, %v2668_v49 }
  0xbf   :  { %1444 = vmatmul.mubr.bf16.gmra.mrb[76].mxu0 %v2669_v50 }
  0xc0   :  { %2523 = vmatmul.mubr.msk.bf16.gmra.mrb[76].mxu1 %vm974_vm0, %v2670_v51  ;;  %1451 = vmatprep.mubr.bf16.mxu0 %v2671_v52 }
  0xc1   :  { %2526 = vmatprep.mubr.msk.bf16.mxu1 %vm974_vm0, %v2673_v53 }
  0xc7   :  { %1452 = vmatmul.mubr.bf16.gmra.mrb[80].mxu0 %v2674_v54 }
  0xc8   :  { %2527 = vmatmul.mubr.msk.bf16.gmra.mrb[80].mxu1 %vm974_vm0, %v2675_v55  ;;  %1459 = vmatprep.mubr.bf16.mxu0 %v2676_v56 }
  0xc9   :  { %2530 = vmatprep.mubr.msk.bf16.mxu1 %vm974_vm0, %v2678_v57 }
  0xcf   :  { %1460 = vmatmul.mubr.bf16.gmra.mrb[84].mxu0 %v2679_v58 }
  0xd0   :  { %2531 = vmatmul.mubr.msk.bf16.gmra.mrb[84].mxu1 %vm974_vm0, %v2680_v59 }
  0xfa   :  { %v2194_v60 = vpop.f32.mrb[0].mxu0 }
  0xfb   :  { %v2258_v61 = vpop.f32.mrb[0].mxu1  ;;  %v2195_v62 = vpop.f32.mrb[1].mxu0 }
  0xfc   :  { %v2196_v63 = vadd.f32 %v2195_v62, %v2194_v60  ;;  %v2259_v0 = vpop.f32.mrb[1].mxu1  ;;  %v2197_v1 = vpop.f32.mrb[2].mxu0 }
  0xfd   :  { %v2260_v2 = vadd.f32 %v2259_v0, %v2258_v61  ;;  %v2261_v3 = vpop.f32.mrb[2].mxu1  ;;  %v2198_v4 = vpop.f32.mrb[3].mxu0 }
  0xfe   :  { %v2199_v5 = vadd.f32 %v2198_v4, %v2197_v1  ;;  %v2262_v6 = vpop.f32.mrb[3].mxu1 }
  0xff   :  { %v3515_v7 = vadd.f32 %v2260_v2, %v2196_v63  ;;  %v2263_v8 = vadd.f32 %v2262_v6, %v2261_v3 }
 0x101   :  { %v3517_v9 = vadd.f32 %v2263_v8, %v2199_v5 }
 0x102   :  { %v2200_v10 = vpop.f32.mrb[4].mxu0 }
 0x103   :  { %v2264_v11 = vpop.f32.mrb[4].mxu1  ;;  %v2201_v12 = vpop.f32.mrb[5].mxu0 }
 0x104   :  { %v2202_v13 = vadd.f32 %v2201_v12, %v2200_v10  ;;  %v2265_v14 = vpop.f32.mrb[5].mxu1  ;;  %v2203_v15 = vpop.f32.mrb[6].mxu0 }
 0x105   :  { %v2266_v16 = vadd.f32 %v2265_v14, %v2264_v11  ;;  %v2267_v17 = vpop.f32.mrb[6].mxu1  ;;  %v2204_v18 = vpop.f32.mrb[7].mxu0 }
 0x106   :  { %v2205_v19 = vadd.f32 %v2204_v18, %v2203_v15  ;;  %v2268_v20 = vpop.f32.mrb[7].mxu1 }
 0x107   :  { %v3519_v21 = vadd.f32 %v2266_v16, %v2202_v13  ;;  %v2269_v22 = vadd.f32 %v2268_v20, %v2267_v17 }
 0x109   :  { %v3521_v23 = vadd.f32 %v2269_v22, %v2205_v19 }
 0x10a   :  { %v2206_v24 = vpop.f32.mrb[8].mxu0 }
 0x10b   :  { %v2270_v25 = vpop.f32.mrb[8].mxu1  ;;  %v2207_v26 = vpop.f32.mrb[9].mxu0 }
 0x10c   :  { %v2208_v27 = vadd.f32 %v2207_v26, %v2206_v24  ;;  %v2271_v28 = vpop.f32.mrb[9].mxu1  ;;  %v2209_v29 = vpop.f32.mrb[10].mxu0 }
 0x10d   :  { %v2272_v30 = vadd.f32 %v2271_v28, %v2270_v25  ;;  %v2273_v31 = vpop.f32.mrb[10].mxu1  ;;  %v2210_v32 = vpop.f32.mrb[11].mxu0 }
 0x10e   :  { %v2211_v33 = vadd.f32 %v2210_v32, %v2209_v29  ;;  %v2274_v34 = vpop.f32.mrb[11].mxu1 }
 0x10f   :  { %v3523_v35 = vadd.f32 %v2272_v30, %v2208_v27  ;;  %v2275_v36 = vadd.f32 %v2274_v34, %v2273_v31 }
 0x111   :  { %v3525_v37 = vadd.f32 %v2275_v36, %v2211_v33 }
 0x112   :  { %v2212_v38 = vpop.f32.mrb[12].mxu0 }
 0x113   :  { %v2276_v39 = vpop.f32.mrb[12].mxu1  ;;  %v2213_v40 = vpop.f32.mrb[13].mxu0 }
 0x114   :  { %v2214_v41 = vadd.f32 %v2213_v40, %v2212_v38  ;;  %v2277_v42 = vpop.f32.mrb[13].mxu1  ;;  %v2215_v43 = vpop.f32.mrb[14].mxu0 }
 0x115   :  { %v2278_v44 = vadd.f32 %v2277_v42, %v2276_v39  ;;  %v2279_v45 = vpop.f32.mrb[14].mxu1  ;;  %v2216_v46 = vpop.f32.mrb[15].mxu0 }
 0x116   :  { %v2217_v47 = vadd.f32 %v2216_v46, %v2215_v43  ;;  %v2280_v48 = vpop.f32.mrb[15].mxu1 }
 0x117   :  { %v3527_v49 = vadd.f32 %v2278_v44, %v2214_v41  ;;  %v2281_v50 = vadd.f32 %v2280_v48, %v2279_v45 }
 0x119   :  { %v3529_v51 = vadd.f32 %v2281_v50, %v2217_v47 }
 0x11a   :  { %v2218_v52 = vpop.f32.mrb[16].mxu0 }
 0x11b   :  { %v2282_v53 = vpop.f32.mrb[16].mxu1  ;;  %v2219_v54 = vpop.f32.mrb[17].mxu0 }
 0x11c   :  { %v2220_v55 = vadd.f32 %v2219_v54, %v2218_v52  ;;  %v2283_v56 = vpop.f32.mrb[17].mxu1  ;;  %v2221_v57 = vpop.f32.mrb[18].mxu0 }
 0x11d   :  { %v2284_v58 = vadd.f32 %v2283_v56, %v2282_v53  ;;  %v2285_v59 = vpop.f32.mrb[18].mxu1  ;;  %v2222_v60 = vpop.f32.mrb[19].mxu0 }
 0x11e   :  { %v2223_v61 = vadd.f32 %v2222_v60, %v2221_v57  ;;  %v2286_v62 = vpop.f32.mrb[19].mxu1 }
 0x11f   :  { %v3531_v63 = vadd.f32 %v2284_v58, %v2220_v55  ;;  %v2287_v0 = vadd.f32 %v2286_v62, %v2285_v59 }
 0x121   :  { %v3533_v1 = vadd.f32 %v2287_v0, %v2223_v61 }
 0x122   :  { %v2224_v2 = vpop.f32.mrb[20].mxu0 }
 0x123   :  { %v2288_v3 = vpop.f32.mrb[20].mxu1  ;;  %v2225_v4 = vpop.f32.mrb[21].mxu0 }
 0x124   :  { %v2226_v5 = vadd.f32 %v2225_v4, %v2224_v2  ;;  %v2289_v6 = vpop.f32.mrb[21].mxu1  ;;  %v2227_v8 = vpop.f32.mrb[22].mxu0 }
 0x125   :  { %v2290_v10 = vadd.f32 %v2289_v6, %v2288_v3  ;;  %v2291_v11 = vpop.f32.mrb[22].mxu1  ;;  %v2228_v12 = vpop.f32.mrb[23].mxu0 }
 0x126   :  { %v2229_v13 = vadd.f32 %v2228_v12, %v2227_v8  ;;  %v2292_v14 = vpop.f32.mrb[23].mxu1 }
 0x127   :  { %v3535_v15 = vadd.f32 %v2290_v10, %v2226_v5  ;;  %v2293_v16 = vadd.f32 %v2292_v14, %v2291_v11 }
 0x129   :  { %v3537_v17 = vadd.f32 %v2293_v16, %v2229_v13 }
 0x12a   :  { %v2230_v18 = vpop.f32.mrb[24].mxu0 }
 0x12b   :  { %v2294_v19 = vpop.f32.mrb[24].mxu1  ;;  %v2231_v20 = vpop.f32.mrb[25].mxu0 }
 0x12c   :  { %v2232_v22 = vadd.f32 %v2231_v20, %v2230_v18  ;;  %v2295_v24 = vpop.f32.mrb[25].mxu1  ;;  %v2233_v25 = vpop.f32.mrb[26].mxu0 }
 0x12d   :  { %v2296_v26 = vadd.f32 %v2295_v24, %v2294_v19  ;;  %v2297_v27 = vpop.f32.mrb[26].mxu1  ;;  %v2234_v28 = vpop.f32.mrb[27].mxu0 }
 0x12e   :  { %v2235_v29 = vadd.f32 %v2234_v28, %v2233_v25  ;;  %v2298_v30 = vpop.f32.mrb[27].mxu1 }
 0x12f   :  { %v3539_v31 = vadd.f32 %v2296_v26, %v2232_v22  ;;  %v2299_v32 = vadd.f32 %v2298_v30, %v2297_v27 }
 0x131   :  { %v3541_v33 = vadd.f32 %v2299_v32, %v2235_v29 }
 0x132   :  { %v2236_v34 = vpop.f32.mrb[28].mxu0 }
 0x133   :  { %v2300_v36 = vpop.f32.mrb[28].mxu1  ;;  %v2237_v38 = vpop.f32.mrb[29].mxu0 }
 0x134   :  { %v2238_v39 = vadd.f32 %v2237_v38, %v2236_v34  ;;  %v2301_v40 = vpop.f32.mrb[29].mxu1  ;;  %v2239_v41 = vpop.f32.mrb[30].mxu0 }
 0x135   :  { %v2302_v42 = vadd.f32 %v2301_v40, %v2300_v36  ;;  %v2303_v43 = vpop.f32.mrb[30].mxu1  ;;  %v2240_v44 = vpop.f32.mrb[31].mxu0 }
 0x136   :  { %v2241_v45 = vadd.f32 %v2240_v44, %v2239_v41  ;;  %v2304_v46 = vpop.f32.mrb[31].mxu1 }
 0x137   :  { %v3543_v47 = vadd.f32 %v2302_v42, %v2238_v39  ;;  %v2305_v48 = vadd.f32 %v2304_v46, %v2303_v43 }
 0x139   :  { %v3545_v50 = vadd.f32 %v2305_v48, %v2241_v45 }
 0x13a   :  { %v2322_v52 = vpop.f32.mrb[32].mxu0 }
 0x13b   :  { %v2386_v53 = vpop.f32.mrb[32].mxu1  ;;  %v2323_v54 = vpop.f32.mrb[33].mxu0 }
 0x13c   :  { %v2324_v55 = vadd.f32 %v2323_v54, %v2322_v52  ;;  %v2387_v56 = vpop.f32.mrb[33].mxu1  ;;  %v2325_v57 = vpop.f32.mrb[34].mxu0 }
 0x13d   :  { %v2388_v58 = vadd.f32 %v2387_v56, %v2386_v53  ;;  %v2389_v59 = vpop.f32.mrb[34].mxu1  ;;  %v2326_v60 = vpop.f32.mrb[35].mxu0 }
 0x13e   :  { %v1228_v61 = vadd.f32 %v2324_v55, %v3515_v7  ;;  %v2327_v62 = vadd.f32 %v2326_v60, %v2325_v57  ;;  %v2390_v0 = vpop.f32.mrb[35].mxu1 }
 0x13f   :  { %v2391_v2 = vadd.f32 %v2390_v0, %v2389_v59 }
 0x140   :  { %v3548_v3 = vadd.f32 %v2388_v58, %v1228_v61  ;;  %v1231_v4 = vadd.f32 %v2327_v62, %v3517_v9 }
 0x142   :  { %v3551_v5 = vadd.f32 %v2391_v2, %v1231_v4  ;;  %v2328_v6 = vpop.f32.mrb[36].mxu0 }
 0x143   :  { %v2392_v8 = vpop.f32.mrb[36].mxu1  ;;  %v2329_v10 = vpop.f32.mrb[37].mxu0 }
 0x144   :  { %v2330_v11 = vadd.f32 %v2329_v10, %v2328_v6  ;;  %v2393_v12 = vpop.f32.mrb[37].mxu1  ;;  %v2331_v13 = vpop.f32.mrb[38].mxu0 }
 0x145   :  { %v2394_v14 = vadd.f32 %v2393_v12, %v2392_v8  ;;  %v2395_v16 = vpop.f32.mrb[38].mxu1  ;;  %v2332_v18 = vpop.f32.mrb[39].mxu0 }
 0x146   :  { %v1236_v7 = vadd.f32 %v2330_v11, %v3519_v21  ;;  %v2333_v19 = vadd.f32 %v2332_v18, %v2331_v13  ;;  %v2396_v20 = vpop.f32.mrb[39].mxu1 }
 0x147   :  { %v2397_v22 = vadd.f32 %v2396_v20, %v2395_v16 }
 0x148   :  { %v3554_v24 = vadd.f32 %v2394_v14, %v1236_v7  ;;  %v1239_v9 = vadd.f32 %v2333_v19, %v3521_v23 }
 0x14a   :  { %v3557_v25 = vadd.f32 %v2397_v22, %v1239_v9  ;;  %v2334_v26 = vpop.f32.mrb[40].mxu0 }
 0x14b   :  { %v2398_v27 = vpop.f32.mrb[40].mxu1  ;;  %v2335_v28 = vpop.f32.mrb[41].mxu0 }
 0x14c   :  { %v2336_v29 = vadd.f32 %v2335_v28, %v2334_v26  ;;  %v2399_v30 = vpop.f32.mrb[41].mxu1  ;;  %v2337_v32 = vpop.f32.mrb[42].mxu0 }
 0x14d   :  { %v2400_v34 = vadd.f32 %v2399_v30, %v2398_v27  ;;  %v2401_v36 = vpop.f32.mrb[42].mxu1  ;;  %v2338_v38 = vpop.f32.mrb[43].mxu0 }
 0x14e   :  { %v1244_v21 = vadd.f32 %v2336_v29, %v3523_v35  ;;  %v2339_v39 = vadd.f32 %v2338_v38, %v2337_v32  ;;  %v2402_v40 = vpop.f32.mrb[43].mxu1 }
 0x14f   :  { %v2403_v41 = vadd.f32 %v2402_v40, %v2401_v36 }
 0x150   :  { %v3560_v42 = vadd.f32 %v2400_v34, %v1244_v21  ;;  %v1247_v23 = vadd.f32 %v2339_v39, %v3525_v37 }
 0x152   :  { %v3563_v43 = vadd.f32 %v2403_v41, %v1247_v23  ;;  %v2340_v44 = vpop.f32.mrb[44].mxu0 }
 0x153   :  { %v2404_v45 = vpop.f32.mrb[44].mxu1  ;;  %v2341_v46 = vpop.f32.mrb[45].mxu0 }
 0x154   :  { %v2342_v48 = vadd.f32 %v2341_v46, %v2340_v44  ;;  %v2405_v52 = vpop.f32.mrb[45].mxu1  ;;  %v2343_v53 = vpop.f32.mrb[46].mxu0 }
 0x155   :  { %v2406_v54 = vadd.f32 %v2405_v52, %v2404_v45  ;;  %v2407_v55 = vpop.f32.mrb[46].mxu1  ;;  %v2344_v56 = vpop.f32.mrb[47].mxu0 }
 0x156   :  { %v1252_v35 = vadd.f32 %v2342_v48, %v3527_v49  ;;  %v2345_v57 = vadd.f32 %v2344_v56, %v2343_v53  ;;  %v2408_v58 = vpop.f32.mrb[47].mxu1 }
 0x157   :  { %v2409_v59 = vadd.f32 %v2408_v58, %v2407_v55 }
 0x158   :  { %v3566_v60 = vadd.f32 %v2406_v54, %v1252_v35  ;;  %v1255_v37 = vadd.f32 %v2345_v57, %v3529_v51 }
 0x15a   :  { %v3569_v61 = vadd.f32 %v2409_v59, %v1255_v37  ;;  %v2346_v62 = vpop.f32.mrb[48].mxu0 }
 0x15b   :  { %v2410_v0 = vpop.f32.mrb[48].mxu1  ;;  %v2347_v2 = vpop.f32.mrb[49].mxu0 }
 0x15c   :  { %v2348_v4 = vadd.f32 %v2347_v2, %v2346_v62  ;;  %v2411_v6 = vpop.f32.mrb[49].mxu1  ;;  %v2349_v8 = vpop.f32.mrb[50].mxu0 }
 0x15d   :  { %v2412_v10 = vadd.f32 %v2411_v6, %v2410_v0  ;;  %v2413_v11 = vpop.f32.mrb[50].mxu1  ;;  %v2350_v12 = vpop.f32.mrb[51].mxu0 }
 0x15e   :  { %v1260_v49 = vadd.f32 %v2348_v4, %v3531_v63  ;;  %v2351_v13 = vadd.f32 %v2350_v12, %v2349_v8  ;;  %v2414_v14 = vpop.f32.mrb[51].mxu1 }
 0x15f   :  { %v2415_v16 = vadd.f32 %v2414_v14, %v2413_v11 }
 0x160   :  { %v3572_v18 = vadd.f32 %v2412_v10, %v1260_v49  ;;  %v1263_v51 = vadd.f32 %v2351_v13, %v3533_v1 }
 0x162   :  { %v3575_v7 = vadd.f32 %v2415_v16, %v1263_v51  ;;  %v2352_v19 = vpop.f32.mrb[52].mxu0 }
 0x163   :  { %v2416_v20 = vpop.f32.mrb[52].mxu1  ;;  %v2353_v22 = vpop.f32.mrb[53].mxu0 }
 0x164   :  { %v2354_v9 = vadd.f32 %v2353_v22, %v2352_v19  ;;  %v2417_v26 = vpop.f32.mrb[53].mxu1  ;;  %v2355_v27 = vpop.f32.mrb[54].mxu0 }
 0x165   :  { %v2418_v28 = vadd.f32 %v2417_v26, %v2416_v20  ;;  %v2419_v29 = vpop.f32.mrb[54].mxu1  ;;  %v2356_v30 = vpop.f32.mrb[55].mxu0 }
 0x166   :  { %v1268_v63 = vadd.f32 %v2354_v9, %v3535_v15  ;;  %v2357_v32 = vadd.f32 %v2356_v30, %v2355_v27  ;;  %v2420_v34 = vpop.f32.mrb[55].mxu1 }
 0x167   :  { %v2421_v36 = vadd.f32 %v2420_v34, %v2419_v29 }
 0x168   :  { %v3578_v38 = vadd.f32 %v2418_v28, %v1268_v63  ;;  %v1271_v1 = vadd.f32 %v2357_v32, %v3537_v17 }
 0x16a   :  { %v3581_v21 = vadd.f32 %v2421_v36, %v1271_v1  ;;  %v2358_v39 = vpop.f32.mrb[56].mxu0 }
 0x16b   :  { %v2422_v40 = vpop.f32.mrb[56].mxu1  ;;  %v2359_v41 = vpop.f32.mrb[57].mxu0 }
 0x16c   :  { %v2360_v23 = vadd.f32 %v2359_v41, %v2358_v39  ;;  %v2423_v44 = vpop.f32.mrb[57].mxu1  ;;  %v2361_v45 = vpop.f32.mrb[58].mxu0 }
 0x16d   :  { %v2424_v46 = vadd.f32 %v2423_v44, %v2422_v40  ;;  %v2425_v48 = vpop.f32.mrb[58].mxu1  ;;  %v2362_v52 = vpop.f32.mrb[59].mxu0 }
 0x16e   :  { %v1276_v15 = vadd.f32 %v2360_v23, %v3539_v31  ;;  %v2363_v53 = vadd.f32 %v2362_v52, %v2361_v45  ;;  %v2426_v54 = vpop.f32.mrb[59].mxu1 }
 0x16f   :  { %v2427_v55 = vadd.f32 %v2426_v54, %v2425_v48 }
 0x170   :  { %v1373_v56 = vadd.f32 %v2424_v46, %v1276_v15  ;;  %v1279_v35 = vadd.f32 %v2363_v53, %v3541_v33 }
 0x172   :  { %v1376_v17 = vadd.f32 %v2427_v55, %v1279_v35  ;;  %v2364_v57 = vpop.f32.mrb[60].mxu0 }
 0x173   :  { %v2428_v58 = vpop.f32.mrb[60].mxu1  ;;  %v2365_v59 = vpop.f32.mrb[61].mxu0 }
 0x174   :  { %v2366_v37 = vadd.f32 %v2365_v59, %v2364_v57  ;;  %v2429_v62 = vpop.f32.mrb[61].mxu1  ;;  %v2367_v0 = vpop.f32.mrb[62].mxu0 }
 0x175   :  { %v2430_v2 = vadd.f32 %v2429_v62, %v2428_v58  ;;  %v2431_v4 = vpop.f32.mrb[62].mxu1  ;;  %v2368_v6 = vpop.f32.mrb[63].mxu0 }
 0x176   :  { %v1284_v8 = vadd.f32 %v2366_v37, %v3543_v47  ;;  %v2369_v10 = vadd.f32 %v2368_v6, %v2367_v0  ;;  %v2432_v31 = vpop.f32.mrb[63].mxu1 }
 0x177   :  { %v2433_v11 = vadd.f32 %v2432_v31, %v2431_v4 }
 0x178   :  { %v1381_v12 = vadd.f32 %v2430_v2, %v1284_v8  ;;  %v1287_v49 = vadd.f32 %v2369_v10, %v3545_v50 }
 0x17a   :  { %v1384_v13 = vadd.f32 %v2433_v11, %v1287_v49  ;;  %v2450_v33 = vpop.f32.mrb[64].mxu0 }
 0x17b   :  { %v2486_v14 = vpop.f32.mrb[64].mxu1  ;;  %v2451_v16 = vpop.f32.mrb[65].mxu0 }
 0x17c   :  { %v2452_v51 = vadd.f32 %v2451_v16, %v2450_v33  ;;  %v2487_v19 = vpop.f32.mrb[65].mxu1  ;;  %v2453_v20 = vpop.f32.mrb[66].mxu0 }
 0x17d   :  { %v2488_v22 = vadd.f32 %v2487_v19, %v2486_v14  ;;  %v2489_v9 = vpop.f32.mrb[66].mxu1  ;;  %v2454_v26 = vpop.f32.mrb[67].mxu0 }
 0x17e   :  { %v2455_v27 = vadd.f32 %v2454_v26, %v2453_v20  ;;  %v2490_v28 = vpop.f32.mrb[67].mxu1  ;;  %v1422_v47 = vadd.f32 %v2452_v51, %v3548_v3 }
 0x17f   :  { %v2491_v29 = vadd.f32 %v2490_v28, %v2489_v9  ;;  %v3588_v30 = vadd.f32 %v2488_v22, %v1373_v56 }
 0x180   :  { %v1425_v63 = vadd.f32 %v2455_v27, %v3551_v5 }
 0x181   :  { %v3591_v50 = vadd.f32 %v2491_v29, %v1376_v17 }
 0x182   :  { %v2456_v32 = vpop.f32.mrb[68].mxu0 }
 0x183   :  { %v2492_v34 = vpop.f32.mrb[68].mxu1  ;;  %v2457_v36 = vpop.f32.mrb[69].mxu0 }
 0x184   :  { %v2458_v1 = vadd.f32 %v2457_v36, %v2456_v32  ;;  %v2493_v39 = vpop.f32.mrb[69].mxu1  ;;  %v2459_v40 = vpop.f32.mrb[70].mxu0 }
 0x185   :  { %v2494_v41 = vadd.f32 %v2493_v39, %v2492_v34  ;;  %v2495_v23 = vpop.f32.mrb[70].mxu1  ;;  %v2460_v44 = vpop.f32.mrb[71].mxu0 }
 0x186   :  { %v2461_v45 = vadd.f32 %v2460_v44, %v2459_v40  ;;  %v2496_v46 = vpop.f32.mrb[71].mxu1  ;;  %v1430_v3 = vadd.f32 %v2458_v1, %v3554_v24 }
 0x187   :  { %v2497_v48 = vadd.f32 %v2496_v46, %v2495_v23  ;;  %v3594_v52 = vadd.f32 %v2494_v41, %v1381_v12 }
 0x188   :  { %v1433_v5 = vadd.f32 %v2461_v45, %v3557_v25 }
 0x189   :  { %v3597_v15 = vadd.f32 %v2497_v48, %v1384_v13 }
 0x18a   :  { %v2462_v53 = vpop.f32.mrb[72].mxu0 }
 0x18b   :  { %v2520_v54 = vpop.f32.mrb[72].mxu1  ;;  %v2463_v55 = vpop.f32.mrb[73].mxu0 }
 0x18c   :  { %v3599_v56 = vadd.f32 %v2520_v54, %v1430_v3  ;;  %v2464_v35 = vadd.f32 %v2463_v55, %v2462_v53  ;;  %v1518_v17 = vpop.f32.mrb[73].mxu1  ;;  %v2465_v57 = vpop.f32.mrb[74].mxu0 }
 0x18d   :  { %v3601_v58 = vadd.f32 %v1518_v17, %v1422_v47  ;;  %v2521_v59 = vpop.f32.mrb[74].mxu1  ;;  %v2466_v24 = vpop.f32.mrb[75].mxu0 }
 0x18e   :  { %v3603_v37 = vadd.f32 %v2521_v59, %v1433_v5  ;;  %v2467_v62 = vadd.f32 %v2466_v24, %v2465_v57  ;;  %v1521_v0 = vpop.f32.mrb[75].mxu1  ;;  %v1588_v25 = vsel %vm1581_vm1, %v3599_v56, 0.0  ;;  %v1438_v2 = vadd.f32 %v2464_v35, %v3560_v42 }
 0x18f   :  { %v3608_v4 = vadd.f32 %v1521_v0, %v1425_v63  ;;  %1589 = vadd.xlane.f32.xlu1 %v1588_v25  ;;  %v1582_v6 = vsel %vm1581_vm1, %v3601_v58, 0.0 }
 0x190   :  { %1583 = vadd.xlane.f32.xlu0 %v1582_v6  ;;  %v1441_v8 = vadd.f32 %v2467_v62, %v3563_v43  ;;  %v1591_v31 = vsel %vm1581_vm1, %v3603_v37, 0.0 }
 0x191   :  { %v1585_v49 = vsel %vm1581_vm1, %v3608_v4, 0.0 }
 0x192   :  { %v2468_v10 = vpop.f32.mrb[76].mxu0 }
 0x193   :  { %v2524_v11 = vpop.f32.mrb[76].mxu1  ;;  %1592 = vadd.xlane.f32.xlu1 %v1591_v31  ;;  %v2469_v12 = vpop.f32.mrb[77].mxu0 }
 0x194   :  { %v2470_v42 = vadd.f32 %v2469_v12, %v2468_v10  ;;  %v1534_v13 = vpop.f32.mrb[77].mxu1  ;;  %1586 = vadd.xlane.f32.xlu0 %v1585_v49  ;;  %v2471_v33 = vpop.f32.mrb[78].mxu0 }
 0x195   :  { %v3617_v14 = vadd.f32 %v1534_v13, %v1438_v2  ;;  %v2525_v16 = vpop.f32.mrb[78].mxu1  ;;  %v2472_v51 = vpop.f32.mrb[79].mxu0 }
 0x196   :  { %v1446_v43 = vadd.f32 %v2470_v42, %v3566_v60  ;;  %v2473_v19 = vadd.f32 %v2472_v51, %v2471_v33  ;;  %v1537_v20 = vpop.f32.mrb[79].mxu1 }
 0x197   :  { %v3620_v22 = vadd.f32 %v1537_v20, %v1441_v8  ;;  %v1594_v9 = vsel %vm1581_vm1, %v3617_v14, 0.0 }
 0x198   :  { %v3624_v26 = vadd.f32 %v2524_v11, %v1446_v43  ;;  %v1449_v27 = vadd.f32 %v2473_v19, %v3569_v61  ;;  %1595 = vadd.xlane.f32.xlu0 %v1594_v9 }
 0x199   :  { %v1597_v28 = vsel %vm1581_vm1, %v3620_v22, 0.0 }
 0x19a   :  { %v3629_v47 = vadd.f32 %v2525_v16, %v1449_v27  ;;  %1598 = vadd.xlane.f32.xlu1 %v1597_v28  ;;  %v2474_v29 = vpop.f32.mrb[80].mxu0  ;;  %v1600_v60 = vsel %vm1581_vm1, %v3624_v26, 0.0 }
 0x19b   :  { %v2475_v63 = vpop.f32.mrb[81].mxu0  ;;  %v2528_v32 = vpop.f32.mrb[80].mxu1 }
 0x19c   :  { %v2476_v34 = vadd.f32 %v2475_v63, %v2474_v29  ;;  %1601 = vadd.xlane.f32.xlu0 %v1600_v60  ;;  %v2477_v36 = vpop.f32.mrb[82].mxu0  ;;  %v1603_v1 = vsel %vm1581_vm1, %v3629_v47, 0.0  ;;  %v1550_v61 = vpop.f32.mrb[81].mxu1 }
 0x19d   :  { %v2478_v39 = vpop.f32.mrb[83].mxu0  ;;  %v2529_v40 = vpop.f32.mrb[82].mxu1 }
 0x19e   :  { %v2479_v41 = vadd.f32 %v2478_v39, %v2477_v36  ;;  %1604 = vadd.xlane.f32.xlu1 %v1603_v1  ;;  %v1454_v23 = vadd.f32 %v2476_v34, %v3572_v18  ;;  %v1553_v44 = vpop.f32.mrb[83].mxu1 }
 0x1a0   :  { %v3636_v45 = vadd.f32 %v1550_v61, %v1454_v23  ;;  %v1457_v46 = vadd.f32 %v2479_v41, %v3575_v7 }
 0x1a2   :  { %v3639_v3 = vadd.f32 %v1553_v44, %v1457_v46  ;;  %v2480_v48 = vpop.f32.mrb[84].mxu0  ;;  %v1606_v5 = vsel %vm1581_vm1, %v3636_v45, 0.0 }
 0x1a3   :  { %v2532_v53 = vpop.f32.mrb[84].mxu1  ;;  %v2481_v54 = vpop.f32.mrb[85].mxu0  ;;  %1607 = vadd.xlane.f32.xlu0 %v1606_v5 }
 0x1a4   :  { %v3644_v55 = vadd.f32 %v2532_v53, %v3594_v52  ;;  %v2482_v35 = vadd.f32 %v2481_v54, %v2480_v48  ;;  %v1566_v17 = vpop.f32.mrb[85].mxu1  ;;  %v2483_v18 = vpop.f32.mrb[86].mxu0  ;;  %v1609_v57 = vsel %vm1581_vm1, %v3639_v3, 0.0 }
 0x1a5   :  { %v3649_v7 = vadd.f32 %v1566_v17, %v3588_v30  ;;  %v2533_v59 = vpop.f32.mrb[86].mxu1  ;;  %v2484_v24 = vpop.f32.mrb[87].mxu0  ;;  %1610 = vadd.xlane.f32.xlu1 %v1609_v57 }
 0x1a6   :  { %v1462_v62 = vadd.f32 %v2482_v35, %v3578_v38  ;;  %v3653_v0 = vadd.f32 %v2533_v59, %v3597_v15  ;;  %v2485_v25 = vadd.f32 %v2484_v24, %v2483_v18  ;;  %v1569_v52 = vpop.f32.mrb[87].mxu1  ;;  %v1624_v31 = vsel %vm1581_vm1, %v3644_v55, 0.0 }
 0x1a7   :  { %v3656_v2 = vadd.f32 %v1569_v52, %v3591_v50  ;;  %v1618_v6 = vsel %vm1581_vm1, %v3649_v7, 0.0 }
 0x1a8   :  { %v3660_v8 = vadd.f32 %v2528_v32, %v1462_v62  ;;  %v1465_v30 = vadd.f32 %v2485_v25, %v3581_v21  ;;  %1619 = vadd.xlane.f32.xlu0 %v1618_v6  ;;  %v1627_v21 = vsel %vm1581_vm1, %v3653_v0, 0.0 }
 0x1a9   :  { %v1621_v10 = vsel %vm1581_vm1, %v3656_v2, 0.0 }
 0x1aa   :  { %v3665_v38 = vadd.f32 %v2529_v40, %v1465_v30  ;;  %1622 = vadd.xlane.f32.xlu1 %v1621_v10  ;;  %v1612_v15 = vsel %vm1581_vm1, %v3660_v8, 0.0 }
 0x1ac   :  { %1613 = vadd.xlane.f32.xlu0 %v1612_v15  ;;  %v1615_v50 = vsel %vm1581_vm1, %v3665_v38, 0.0 }
 0x1ae   :  { %1616 = vadd.xlane.f32.xlu1 %v1615_v50 }
 0x1b0   :  { %1625 = vadd.xlane.f32.xlu0 %v1624_v31 }
 0x1b2   :  { %1628 = vadd.xlane.f32.xlu1 %v1627_v21 }
 0x21c   :  { %v1590_v11 = vpop.xlane.xlu1 %1589 }
 0x21d   :  { %v3675_v12 = vmul.f32 0.020408163, %v1590_v11  ;;  %v1584_v49 = vpop.xlane.xlu0 %1583 }
 0x21e   :  { %v3677_v42 = vmul.f32 0.020408163, %v1584_v49 }
 0x21f   :  { %v1648_v13 = vsub.f32 %v3599_v56, %v3675_v12 }
 0x220   :  { %v1646_v33 = vsub.f32 %v3601_v58, %v3677_v42  ;;  %v1593_v16 = vpop.xlane.xlu1 %1592 }
 0x221   :  { %v3683_v51 = vmul.f32 0.020408163, %v1593_v16  ;;  %v1587_v43 = vpop.xlane.xlu0 %1586  ;;  %v1664_v19 = vmul.f32 %v1648_v13, %v1648_v13 }
 0x222   :  { %v3685_v20 = vmul.f32 0.020408163, %v1587_v43  ;;  %v1662_v28 = vmul.f32 %v1646_v33, %v1646_v33 }
 0x223   :  { %v1649_v9 = vsub.f32 %v3603_v37, %v3683_v51  ;;  %v1684_v27 = vsel %vm1581_vm1, %v1664_v19, 0.0 }
 0x224   :  { %v1647_v29 = vsub.f32 %v3608_v4, %v3685_v20  ;;  %1685 = vadd.xlane.f32.xlu0 %v1684_v27  ;;  %v1678_v1 = vsel %vm1581_vm1, %v1662_v28, 0.0 }
 0x225   :  { %v1596_v60 = vpop.xlane.xlu0 %1595  ;;  %v1665_v63 = vmul.f32 %v1649_v9, %v1649_v9 }
 0x226   :  { %v3692_v32 = vmul.f32 0.020408163, %v1596_v60  ;;  %v1663_v61 = vmul.f32 %v1647_v29, %v1647_v29 }
 0x227   :  { %v1599_v34 = vpop.xlane.xlu1 %1598  ;;  %v1687_v36 = vsel %vm1581_vm1, %v1665_v63, 0.0 }
 0x228   :  { %v1650_v39 = vsub.f32 %v3617_v14, %v3692_v32  ;;  %v3698_v40 = vmul.f32 0.020408163, %v1599_v34  ;;  %1688 = vadd.xlane.f32.xlu1 %v1687_v36  ;;  %1679 = vadd.xlane.f32.xlu0 %v1678_v1  ;;  %v1681_v5 = vsel %vm1581_vm1, %v1663_v61, 0.0 }
 0x229   :  { %v1602_v41 = vpop.xlane.xlu0 %1601 }
 0x22a   :  { %v1651_v23 = vsub.f32 %v3620_v22, %v3698_v40  ;;  %v3702_v44 = vmul.f32 0.020408163, %v1602_v41  ;;  %v1666_v46 = vmul.f32 %v1650_v39, %v1650_v39 }
 0x22b   :  { %v1605_v48 = vpop.xlane.xlu1 %1604 }
 0x22c   :  { %v1652_v53 = vsub.f32 %v3624_v26, %v3702_v44  ;;  %v3707_v54 = vmul.f32 0.020408163, %v1605_v48  ;;  %1682 = vadd.xlane.f32.xlu1 %v1681_v5  ;;  %v1690_v35 = vsel %vm1581_vm1, %v1666_v46, 0.0  ;;  %v1667_v17 = vmul.f32 %v1651_v23, %v1651_v23 }
 0x22d   :  { %1691 = vadd.xlane.f32.xlu0 %v1690_v35 }
 0x22e   :  { %v1653_v18 = vsub.f32 %v3629_v47, %v3707_v54  ;;  %v1693_v57 = vsel %vm1581_vm1, %v1667_v17, 0.0  ;;  %v1668_v59 = vmul.f32 %v1652_v53, %v1652_v53 }
 0x230   :  { %1694 = vadd.xlane.f32.xlu1 %v1693_v57  ;;  %v1696_v24 = vsel %vm1581_vm1, %v1668_v59, 0.0  ;;  %v1608_v62 = vpop.xlane.xlu0 %1607  ;;  %v1669_v25 = vmul.f32 %v1653_v18, %v1653_v18  ;;  %v2713_v57 = vmov 0  }
 0x231   :  { %1697 = vadd.xlane.f32.xlu0 %v1696_v24  ;;  %v3714_v52 = vmul.f32 0.020408163, %v1608_v62  ;;  %2551 = vset.pattern.permute.xlu1 %v2713_v57 }
 0x232   :  { %v1611_v6 = vpop.xlane.xlu1 %1610  ;;  %v1699_v30 = vsel %vm1581_vm1, %v1669_v25, 0.0  ;;  %2552 = vset.pattern.permute.xlu0 %v2713_v57 }
 0x233   :  { %v1654_v10 = vsub.f32 %v3636_v45, %v3714_v52  ;;  %v3719_v15 = vmul.f32 0.020408163, %v1611_v6 }
 0x234   :  { %1700 = vadd.xlane.f32.xlu1 %v1699_v30 }
 0x235   :  { %v1655_v50 = vsub.f32 %v3639_v3, %v3719_v15  ;;  %v1620_v31 = vpop.xlane.xlu0 %1619  ;;  %v1670_v21 = vmul.f32 %v1654_v10, %v1654_v10 }
 0x236   :  { %v3723_v11 = vmul.f32 0.020408163, %v1620_v31 }
 0x237   :  { %v1623_v49 = vpop.xlane.xlu1 %1622  ;;  %v1702_v13 = vsel %vm1581_vm1, %v1670_v21, 0.0  ;;  %v1671_v33 = vmul.f32 %v1655_v50, %v1655_v50 }
 0x238   :  { %v1658_v16 = vsub.f32 %v3649_v7, %v3723_v11  ;;  %v3728_v43 = vmul.f32 0.020408163, %v1623_v49  ;;  %1703 = vadd.xlane.f32.xlu0 %v1702_v13 }
 0x239   :  { %v1614_v19 = vpop.xlane.xlu0 %1613  ;;  %v1705_v9 = vsel %vm1581_vm1, %v1671_v33, 0.0 }
 0x23a   :  { %v1659_v27 = vsub.f32 %v3656_v2, %v3728_v43  ;;  %v3733_v28 = vmul.f32 0.020408163, %v1614_v19  ;;  %1706 = vadd.xlane.f32.xlu1 %v1705_v9  ;;  %v1674_v29 = vmul.f32 %v1658_v16, %v1658_v16 }
 0x23b   :  { %v1617_v60 = vpop.xlane.xlu1 %1616 }
 0x23c   :  { %v1656_v63 = vsub.f32 %v3660_v8, %v3733_v28  ;;  %v1714_v34 = vsel %vm1581_vm1, %v1674_v29, 0.0  ;;  %v1675_v36 = vmul.f32 %v1659_v27, %v1659_v27  ;;  %v3738_v61 = vmul.f32 0.020408163, %v1617_v60 }
 0x23d   :  { %1715 = vadd.xlane.f32.xlu0 %v1714_v34  ;;  %v1626_v1 = vpop.xlane.xlu0 %1625  ;;  %v1744_v34 = vld [vmem:[%s3949_s2 + $0x10] sm:$0xff] }
 0x23e   :  { %v3740_v39 = vmul.f32 0.020408163, %v1626_v1  ;;  %v1717_v41 = vsel %vm1581_vm1, %v1675_v36, 0.0  ;;  %v1672_v23 = vmul.f32 %v1656_v63, %v1656_v63  ;;  %v1657_v35 = vsub.f32 %v3665_v38, %v3738_v61 }
 0x23f   :  { %v1629_v46 = vpop.xlane.xlu1 %1628  ;;  %1718 = vadd.xlane.f32.xlu1 %v1717_v41 }
 0x240   :  { %v1660_v48 = vsub.f32 %v3644_v55, %v3740_v39  ;;  %v3745_v5 = vmul.f32 0.020408163, %v1629_v46  ;;  %v1708_v53 = vsel %vm1581_vm1, %v1672_v23, 0.0  ;;  %v1673_v25 = vmul.f32 %v1657_v35, %v1657_v35 }
 0x241   :  { %1709 = vadd.xlane.f32.xlu0 %v1708_v53  ;;  %v1745_v53 = vld [vmem:[%s3949_s2 + $0x18] sm:$0xff] }
 0x242   :  { %v1661_v17 = vsub.f32 %v3653_v0, %v3745_v5  ;;  %v1676_v18 = vmul.f32 %v1660_v48, %v1660_v48  ;;  %v1711_v6 = vsel %vm1581_vm1, %v1673_v25, 0.0 }
 0x244   :  { %v1720_v59 = vsel %vm1581_vm1, %v1676_v18, 0.0  ;;  %v1677_v24 = vmul.f32 %v1661_v17, %v1661_v17  ;;  %v1742_v17 = vld [vmem:[%s3949_s2] sm:$0xff] }
 0x245   :  { %1721 = vadd.xlane.f32.xlu0 %v1720_v59 }
 0x246   :  { %v1723_v62 = vsel %vm1581_vm1, %v1677_v24, 0.0 }
 0x247   :  { %1724 = vadd.xlane.f32.xlu1 %v1723_v62 }
 0x24b   :  { %1712 = vadd.xlane.f32.xlu1 %v1711_v6  ;;  %v1743_v6 = vld [vmem:[%s3949_s2 + $0x8] sm:$0xff] }
 0x2b1   :  { %v1686_v30 = vpop.xlane.xlu0 %1685 }
 0x2b2   :  { %v1728_v10 = vmul.f32 0.020408163, %v1686_v30  ;;  %v1809_v30 = vld [vmem:[%s3950_s3 + $0x18] sm:$0xff] }
 0x2b4   :  { %v1760_v50 = vadd.f32 1e-05, %v1728_v10 }
 0x2b5   :  { %v1689_v31 = vpop.xlane.xlu1 %1688  ;;  %v1680_v21 = vpop.xlane.xlu0 %1679 }
 0x2b6   :  { %2681 = vrsqrt.f32 %v1760_v50  ;;  %v1729_v49 = vmul.f32 0.020408163, %v1689_v31  ;;  %v1726_v13 = vmul.f32 0.020408163, %v1680_v21 }
 0x2b8   :  { %v1761_v33 = vadd.f32 1e-05, %v1729_v49  ;;  %v1758_v16 = vadd.f32 1e-05, %v1726_v13 }
 0x2b9   :  { %v1683_v19 = vpop.xlane.xlu1 %1682 }
 0x2ba   :  { %2683 = vrsqrt.f32 %v1761_v33  ;;  %v1727_v9 = vmul.f32 0.020408163, %v1683_v19  ;;  %v1692_v29 = vpop.xlane.xlu0 %1691 }
 0x2bb   :  { %2685 = vrsqrt.f32 %v1758_v16  ;;  %v1730_v1 = vmul.f32 0.020408163, %v1692_v29  ;;  %v1807_v29 = vld [vmem:[%s3950_s3 + $0x8] sm:$0xff] }
 0x2bc   :  { %v1759_v27 = vadd.f32 1e-05, %v1727_v9 }
 0x2bd   :  { %v1695_v60 = vpop.xlane.xlu1 %1694  ;;  %v1762_v57 = vadd.f32 1e-05, %v1730_v1 }
 0x2be   :  { %2687 = vrsqrt.f32 %v1759_v27  ;;  %v1731_v63 = vmul.f32 0.020408163, %v1695_v60  ;;  %v1698_v35 = vpop.xlane.xlu0 %1697  ;;  %v1808_v27 = vld [vmem:[%s3950_s3 + $0x10] sm:$0xff] }
 0x2bf   :  { %v1732_v49 = vmul.f32 0.020408163, %v1698_v35 }
 0x2c0   :  { %v2682_v36 = vpop.eup %2681  ;;  %v1763_v41 = vadd.f32 1e-05, %v1731_v63 }
 0x2c1   :  { %v1701_v23 = vpop.xlane.xlu1 %1700  ;;  %v1792_v46 = vmul.f32 %v2682_v36, %v1744_v34  ;;  %v1764_v34 = vadd.f32 1e-05, %v1732_v49  ;;  %v1751_v49 = vld [vmem:[%s3949_s2 + $0x48] sm:$0xff] }
 0x2c2   :  { %2689 = vrsqrt.f32 %v1763_v41  ;;  %v1733_v48 = vmul.f32 0.020408163, %v1701_v23 }
 0x2c3   :  { %1866 = vperm.xlu1 %2551, %v1792_v46   ;;  %v1824_v19 = vmul.f32 %v1792_v46, %v3675_v12  ;;  %v1811_v46 = vld [vmem:[%s3950_s3 + $0x28] sm:$0xff] }
 0x2c4   :  { %v2684_v18 = vpop.eup %2683  ;;  %v1765_v59 = vadd.f32 1e-05, %v1733_v48  ;;  %v1806_v48 = vld [vmem:[%s3950_s3] sm:$0xff] }
 0x2c5   :  { %v2686_v24 = vpop.eup %2685  ;;  %v1793_v62 = vmul.f32 %v2684_v18, %v1745_v53  ;;  %v1704_v10 = vpop.xlane.xlu0 %1703  ;;  %v1840_v36 = vsub.f32 %v1808_v27, %v1824_v19 }
 0x2c6   :  { %2691 = vrsqrt.f32 %v1765_v59  ;;  %v1790_v25 = vmul.f32 %v2686_v24, %v1742_v17  ;;  %v1813_v24 = vld [vmem:[%s3950_s3 + $0x38] sm:$0xff]  ;;  %v1734_v19 = vmul.f32 0.020408163, %v1704_v10  ;;  %v1810_v10 = vld [vmem:[%s3950_s3 + $0x20] sm:$0xff] }
 0x2c7   :  { %1871 = vperm.xlu1 %2551, %v1793_v62   ;;  %v1707_v50 = vpop.xlane.xlu1 %1706  ;;  %v1825_v31 = vmul.f32 %v1793_v62, %v3683_v51  ;;  %2693 = vrsqrt.f32 %v1762_v57  ;;  %v1747_v51 = vld [vmem:[%s3949_s2 + $0x28] sm:$0xff]  ;;  %v1746_v62 = vld [vmem:[%s3949_s2 + $0x20] sm:$0xff] }
 0x2c8   :  { %v2688_v21 = vpop.eup %2687  ;;  %1856 = vperm.xlu0 %2552, %v1790_v25   ;;  %v1735_v13 = vmul.f32 0.020408163, %v1707_v50  ;;  %v1822_v23 = vmul.f32 %v1790_v25, %v3677_v42 }
 0x2c9   :  { %v1791_v33 = vmul.f32 %v2688_v21, %v1743_v6  ;;  %v1841_v16 = vsub.f32 %v1809_v30, %v1825_v31 }
 0x2ca   :  { %v1767_v9 = vadd.f32 1e-05, %v1735_v13  ;;  %v1716_v12 = vpop.xlane.xlu0 %1715  ;;  %v1838_v18 = vsub.f32 %v1806_v48, %v1822_v23 }
 0x2cb   :  { %1861 = vperm.xlu1 %2551, %v1791_v33   ;;  %v1823_v60 = vmul.f32 %v1791_v33, %v3685_v20  ;;  %v1749_v20 = vld [vmem:[%s3949_s2 + $0x38] sm:$0xff] }
 0x2cc   :  { %v2690_v63 = vpop.eup %2689  ;;  %2695 = vrsqrt.f32 %v1767_v9  ;;  %1967 = vperm.xlu0 %2552, %v1841_v16   ;;  %v1719_v17 = vpop.xlane.xlu1 %1718 }
 0x2cd   :  { %v1839_v1 = vsub.f32 %v1807_v29, %v1823_v60  ;;  %v1795_v41 = vmul.f32 %v2690_v63, %v1747_v51  ;;  %2697 = vrsqrt.f32 %v1764_v34  ;;  %v1739_v25 = vmul.f32 0.020408163, %v1719_v17  ;;  %v1748_v51 = vld [vmem:[%s3949_s2 + $0x30] sm:$0xff] }
 0x2ce   :  { %v1710_v6 = vpop.xlane.xlu0 %1709  ;;  %v1766_v63 = vadd.f32 1e-05, %v1734_v19  ;;  %v1819_v19 = vld [vmem:[%s3950_s3 + $0x68] sm:$0xff] }
 0x2cf   :  { %1962 = vperm.xlu1 %2551, %v1840_v36   ;;  %v1827_v53 = vmul.f32 %v1795_v41, %v3698_v40  ;;  %v1771_v33 = vadd.f32 1e-05, %v1739_v25 }
 0x2d0   :  { %v2692_v35 = vpop.eup %2691  ;;  %1957 = vperm.xlu0 %2552, %v1839_v1  }
 0x2d1   :  { %v1843_v42 = vsub.f32 %v1811_v46, %v1827_v53  ;;  %v1797_v57 = vmul.f32 %v2692_v35, %v1749_v20  ;;  %v2694_v59 = vpop.eup %2693  ;;  %v1738_v46 = vmul.f32 0.020408163, %v1716_v12  ;;  %v1812_v12 = vld [vmem:[%s3950_s3 + $0x30] sm:$0xff] }
 0x2d2   :  { %v1794_v21 = vmul.f32 %v2694_v59, %v1746_v62  ;;  %v1722_v29 = vpop.xlane.xlu0 %1721  ;;  %v1736_v59 = vmul.f32 0.020408163, %v1710_v6 }
 0x2d3   :  { %1952 = vperm.xlu1 %2551, %v1838_v18   ;;  %v1829_v40 = vmul.f32 %v1797_v57, %v3707_v54  ;;  %v1740_v34 = vmul.f32 0.020408163, %v1722_v29  ;;  %v1770_v35 = vadd.f32 1e-05, %v1738_v46 }
 0x2d4   :  { %1977 = vperm.xlu0 %2552, %v1843_v42   ;;  %v1725_v30 = vpop.xlane.xlu1 %1724  ;;  %v1826_v1 = vmul.f32 %v1794_v21, %v3692_v32  ;;  %v1755_v42 = vld [vmem:[%s3949_s2 + $0x68] sm:$0xff] }
 0x2d5   :  { %v1741_v50 = vmul.f32 0.020408163, %v1725_v30  ;;  %v1845_v31 = vsub.f32 %v1813_v24, %v1829_v40  ;;  %v1772_v48 = vadd.f32 1e-05, %v1740_v34  ;;  %v1815_v40 = vld [vmem:[%s3950_s3 + $0x48] sm:$0xff] }
 0x2d6   :  { %v2696_v13 = vpop.eup %2695  ;;  %v1842_v20 = vsub.f32 %v1810_v10, %v1826_v1 }
 0x2d7   :  { %v1773_v16 = vadd.f32 1e-05, %v1741_v50  ;;  %1876 = vperm.xlu1 %2551, %v1794_v21   ;;  %v1799_v27 = vmul.f32 %v2696_v13, %v1751_v49  ;;  %v2698_v54 = vpop.eup %2697  ;;  %v1768_v50 = vadd.f32 1e-05, %v1736_v59  ;;  %v1756_v49 = vld [vmem:[%s3949_s2 + $0x70] sm:$0xff] }
 0x2d8   :  { %1987 = vperm.xlu0 %2552, %v1845_v31   ;;  %v1713_v9 = vpop.xlane.xlu1 %1712  ;;  %v1796_v36 = vmul.f32 %v2698_v54, %v1748_v51 }
 0x2d9   :  { %2699 = vrsqrt.f32 %v1773_v16  ;;  %v1737_v60 = vmul.f32 0.020408163, %v1713_v9  ;;  %v1831_v62 = vmul.f32 %v1799_v27, %v3719_v15  ;;  %v1753_v15 = vld [vmem:[%s3949_s2 + $0x58] sm:$0xff] }
 0x2da   :  { %2701 = vrsqrt.f32 %v1771_v33  ;;  %v1828_v18 = vmul.f32 %v1796_v36, %v3702_v44  ;;  %v1750_v44 = vld [vmem:[%s3949_s2 + $0x40] sm:$0xff] }
 0x2db   :  { %1881 = vperm.xlu1 %2551, %v1795_v41   ;;  %v1769_v23 = vadd.f32 1e-05, %v1737_v60  ;;  %2703 = vrsqrt.f32 %v1766_v63  ;;  %v1757_v41 = vld [vmem:[%s3949_s2 + $0x78] sm:$0xff]  ;;  %v1847_v31 = vsub.f32 %v1815_v40, %v1831_v62  ;;  %v1814_v63 = vld [vmem:[%s3950_s3 + $0x40] sm:$0xff] }
 0x2dc   :  { %1901 = vperm.xlu0 %2552, %v1799_v27   ;;  %v1844_v25 = vsub.f32 %v1812_v12, %v1828_v18  ;;  %v1754_v27 = vld [vmem:[%s3949_s2 + $0x60] sm:$0xff] }
 0x2dd   :  { %2705 = vrsqrt.f32 %v1769_v23 }
 0x2de   :  { %2707 = vrsqrt.f32 %v1772_v48 }
 0x2df   :  { %1886 = vperm.xlu1 %2551, %v1796_v36   ;;  %2709 = vrsqrt.f32 %v1770_v35 }
 0x2e0   :  { %2711 = vrsqrt.f32 %v1768_v50 }
 0x2e3   :  { %v2700_v53 = vpop.eup %2699  ;;  %1972 = vperm.xlu1 %2551, %v1842_v20  }
 0x2e4   :  { %v1805_v32 = vmul.f32 %v2700_v53, %v1757_v41  ;;  %v2702_v17 = vpop.eup %2701  ;;  %v1816_v53 = vld [vmem:[%s3950_s3 + $0x50] sm:$0xff] }
 0x2e5   :  { %v1803_v24 = vmul.f32 %v2702_v17, %v1755_v42  ;;  %v2704_v30 = vpop.eup %2703 }
 0x2e6   :  { %1931 = vperm.xlu0 %2552, %v1805_v32   ;;  %v1798_v21 = vmul.f32 %v2704_v30, %v1750_v44  ;;  %v1837_v36 = vmul.f32 %v1805_v32, %v3745_v5  ;;  %v1818_v5 = vld [vmem:[%s3950_s3 + $0x60] sm:$0xff] }
 0x2e7   :  { %1891 = vperm.xlu1 %2551, %v1797_v57   ;;  %v2706_v57 = vpop.eup %2705  ;;  %v1835_v33 = vmul.f32 %v1803_v24, %v3728_v43  ;;  %v1817_v43 = vld [vmem:[%s3950_s3 + $0x58] sm:$0xff] }
 0x2e8   :  { %v2708_v6 = vpop.eup %2707  ;;  %v1801_v13 = vmul.f32 %v2706_v57, %v1753_v15  ;;  %v1830_v60 = vmul.f32 %v1798_v21, %v3714_v52  ;;  %v1752_v52 = vld [vmem:[%s3949_s2 + $0x50] sm:$0xff] }
 0x2e9   :  { %v1804_v16 = vmul.f32 %v2708_v6, %v1756_v49  ;;  %v2710_v9 = vpop.eup %2709  ;;  %v1851_v29 = vsub.f32 %v1819_v19, %v1835_v33 }
 0x2ea   :  { %1921 = vperm.xlu0 %2552, %v1803_v24   ;;  %v1833_v54 = vmul.f32 %v1801_v13, %v3738_v61  ;;  %v1802_v51 = vmul.f32 %v2710_v9, %v1754_v27  ;;  %v1846_v1 = vsub.f32 %v1814_v63, %v1830_v60  ;;  %v1821_v61 = vld [vmem:[%s3950_s3 + $0x78] sm:$0xff]  ;;  %v2712_v10 = vpop.eup %2711 }
 0x2eb   :  { %1982 = vperm.xlu1 %2551, %v1844_v25   ;;  %v1853_v23 = vsub.f32 %v1821_v61, %v1837_v36  ;;  %v1800_v46 = vmul.f32 %v2712_v10, %v1752_v52  ;;  %v1836_v32 = vmul.f32 %v1804_v16, %v3740_v39 }
 0x2ec   :  { %v1849_v34 = vsub.f32 %v1817_v43, %v1833_v54  ;;  %v1834_v48 = vmul.f32 %v1802_v51, %v3723_v11  ;;  %v1820_v11 = vld [vmem:[%s3950_s3 + $0x70] sm:$0xff] }
 0x2ed   :  { %v1832_v41 = vmul.f32 %v1800_v46, %v3733_v28  ;;  %v1852_v17 = vsub.f32 %v1820_v11, %v1836_v32 }
 0x2ee   :  { %1997 = vperm.xlu0 %2552, %v1847_v31   ;;  %v1850_v20 = vsub.f32 %v1818_v5, %v1834_v48 }
 0x2ef   :  { %1896 = vperm.xlu1 %2551, %v1798_v21   ;;  %v1848_v35 = vsub.f32 %v1816_v53, %v1832_v41 }
 0x2f2   :  { %1911 = vperm.xlu0 %2552, %v1801_v13  }
 0x2f3   :  { %1926 = vperm.xlu1 %2551, %v1804_v16  }
 0x2f6   :  { %2017 = vperm.xlu0 %2552, %v1851_v29  }
 0x2f7   :  { %1916 = vperm.xlu1 %2551, %v1802_v51  }
 0x2fa   :  { %2007 = vperm.xlu0 %2552, %v1849_v34  }
 0x2fb   :  { %1992 = vperm.xlu1 %2551, %v1846_v1  }
 0x2fe   :  { %2027 = vperm.xlu0 %2552, %v1853_v23  }
 0x2ff   :  { %1906 = vperm.xlu1 %2551, %v1800_v46  }
 0x303   :  { %2012 = vperm.xlu1 %2551, %v1850_v20  }
 0x307   :  { %2002 = vperm.xlu1 %2551, %v1848_v35  }
 0x30b   :  { %2022 = vperm.xlu1 %2551, %v1852_v17  }
 0x342   :  { %v1867_v42 = vpop.permute.xlu1 %1866 }
 0x343   :  { %v1936_v25 = vmul.f32 %v1867_v42, %v3599_v56 }
 0x346   :  { %v1872_v18 = vpop.permute.xlu1 %1871 }
 0x347   :  { %v1857_v12 = vpop.permute.xlu0 %1856  ;;  %v1937_v28 = vmul.f32 %v1872_v18, %v3603_v37 }
 0x348   :  { %v1934_v57 = vmul.f32 %v1857_v12, %v3601_v58 }
 0x34a   :  { %v1862_v59 = vpop.permute.xlu1 %1861 }
 0x34b   :  { %v1968_v24 = vpop.permute.xlu0 %1967  ;;  %v1935_v40 = vmul.f32 %v1862_v59, %v3608_v4 }
 0x34c   :  { %v2033_v62 = vadd.f32 %v1968_v24, %v1937_v28 }
 0x34e   :  { %v2049_v39 = vmax.f32 %v2033_v62, 0.0  ;;  %v1963_v30 = vpop.permute.xlu1 %1962 }
 0x34f   :  { %v2032_v44 = vadd.f32 %v1963_v30, %v1936_v25  ;;  %v1958_v50 = vpop.permute.xlu0 %1957 }
 0x350   :  { %2065 = vst.msk [vmem:[%s3951_s4 + $0x18] sm:$0xff] %vm1581_vm1, %v2049_v39  ;;  %v2031_v31 = vadd.f32 %v1958_v50, %v1935_v40 }
 0x351   :  { %v2048_v37 = vmax.f32 %v2032_v44, 0.0 }
 0x352   :  { %v2047_v21 = vmax.f32 %v2031_v31, 0.0  ;;  %v1953_v15 = vpop.permute.xlu1 %1952 }
 0x353   :  { %2064 = vst.msk [vmem:[%s3951_s4 + $0x10] sm:$0xff] %vm1581_vm1, %v2048_v37  ;;  %v2030_v56 = vadd.f32 %v1953_v15, %v1934_v57  ;;  %v1978_v6 = vpop.permute.xlu0 %1977 }
 0x354   :  { %2063 = vst.msk [vmem:[%s3951_s4 + $0x8] sm:$0xff] %vm1581_vm1, %v2047_v21 }
 0x355   :  { %v2046_v4 = vmax.f32 %v2030_v56, 0.0 }
 0x356   :  { %v1877_v49 = vpop.permute.xlu1 %1876 }
 0x357   :  { %2062 = vst.msk [vmem:[%s3951_s4] sm:$0xff] %vm1581_vm1, %v2046_v4  ;;  %v1988_v13 = vpop.permute.xlu0 %1987  ;;  %v1938_v27 = vmul.f32 %v1877_v49, %v3617_v14 }
 0x35a   :  { %v1882_v58 = vpop.permute.xlu1 %1881 }
 0x35b   :  { %v1939_v33 = vmul.f32 %v1882_v58, %v3620_v22  ;;  %v1902_v29 = vpop.permute.xlu0 %1901 }
 0x35c   :  { %v1943_v52 = vmul.f32 %v1902_v29, %v3639_v3 }
 0x35d   :  { %v2035_v16 = vadd.f32 %v1978_v6, %v1939_v33 }
 0x35e   :  { %v1887_v19 = vpop.permute.xlu1 %1886 }
 0x35f   :  { %v2051_v9 = vmax.f32 %v2035_v16, 0.0  ;;  %v1940_v14 = vmul.f32 %v1887_v19, %v3624_v26 }
 0x361   :  { %2067 = vst.msk [vmem:[%s3951_s4 + $0x28] sm:$0xff] %vm1581_vm1, %v2051_v9 }
 0x362   :  { %v1973_v54 = vpop.permute.xlu1 %1972 }
 0x363   :  { %v2034_v51 = vadd.f32 %v1973_v54, %v1938_v27 }
 0x365   :  { %v2050_v43 = vmax.f32 %v2034_v51, 0.0  ;;  %v1932_v60 = vpop.permute.xlu0 %1931 }
 0x366   :  { %v1892_v63 = vpop.permute.xlu1 %1891  ;;  %v1949_v59 = vmul.f32 %v1932_v60, %v3653_v0 }
 0x367   :  { %2066 = vst.msk [vmem:[%s3951_s4 + $0x20] sm:$0xff] %vm1581_vm1, %v2050_v43  ;;  %v1941_v22 = vmul.f32 %v1892_v63, %v3629_v47 }
 0x369   :  { %v2037_v34 = vadd.f32 %v1988_v13, %v1941_v22  ;;  %v1922_v36 = vpop.permute.xlu0 %1921 }
 0x36a   :  { %v1983_v1 = vpop.permute.xlu1 %1982  ;;  %v1947_v20 = vmul.f32 %v1922_v36, %v3656_v2 }
 0x36b   :  { %v2053_v61 = vmax.f32 %v2037_v34, 0.0  ;;  %v2036_v10 = vadd.f32 %v1983_v1, %v1940_v14 }
 0x36d   :  { %2069 = vst.msk [vmem:[%s3951_s4 + $0x38] sm:$0xff] %vm1581_vm1, %v2053_v61  ;;  %v2052_v23 = vmax.f32 %v2036_v10, 0.0  ;;  %v1998_v46 = vpop.permute.xlu0 %1997 }
 0x36e   :  { %v2039_v48 = vadd.f32 %v1998_v46, %v1943_v52  ;;  %v1897_v5 = vpop.permute.xlu1 %1896 }
 0x36f   :  { %2068 = vst.msk [vmem:[%s3951_s4 + $0x30] sm:$0xff] %vm1581_vm1, %v2052_v23  ;;  %v1942_v17 = vmul.f32 %v1897_v5, %v3636_v45 }
 0x370   :  { %v2055_v26 = vmax.f32 %v2039_v48, 0.0 }
 0x371   :  { %v1912_v47 = vpop.permute.xlu0 %1911 }
 0x372   :  { %2071 = vst.msk [vmem:[%s3951_s4 + $0x48] sm:$0xff] %vm1581_vm1, %v2055_v26  ;;  %v1927_v3 = vpop.permute.xlu1 %1926  ;;  %v1945_v32 = vmul.f32 %v1912_v47, %v3665_v38 }
 0x373   :  { %v1948_v57 = vmul.f32 %v1927_v3, %v3644_v55 }
 0x375   :  { %v2018_v41 = vpop.permute.xlu0 %2017 }
 0x376   :  { %v2043_v53 = vadd.f32 %v2018_v41, %v1947_v20  ;;  %v1917_v35 = vpop.permute.xlu1 %1916 }
 0x377   :  { %v1946_v40 = vmul.f32 %v1917_v35, %v3649_v7 }
 0x378   :  { %v2059_v11 = vmax.f32 %v2043_v53, 0.0 }
 0x379   :  { %v2008_v42 = vpop.permute.xlu0 %2007 }
 0x37a   :  { %2075 = vst.msk [vmem:[%s3951_s4 + $0x68] sm:$0xff] %vm1581_vm1, %v2059_v11  ;;  %v2041_v18 = vadd.f32 %v2008_v42, %v1945_v32  ;;  %v1993_v12 = vpop.permute.xlu1 %1992 }
 0x37b   :  { %v2038_v28 = vadd.f32 %v1993_v12, %v1942_v17 }
 0x37c   :  { %v2057_v2 = vmax.f32 %v2041_v18, 0.0 }
 0x37d   :  { %v2054_v24 = vmax.f32 %v2038_v28, 0.0  ;;  %v2028_v62 = vpop.permute.xlu0 %2027 }
 0x37e   :  { %2073 = vst.msk [vmem:[%s3951_s4 + $0x58] sm:$0xff] %vm1581_vm1, %v2057_v2  ;;  %v2045_v45 = vadd.f32 %v2028_v62, %v1949_v59  ;;  %v1907_v38 = vpop.permute.xlu1 %1906 }
 0x37f   :  { %2070 = vst.msk [vmem:[%s3951_s4 + $0x40] sm:$0xff] %vm1581_vm1, %v2054_v24  ;;  %v1944_v30 = vmul.f32 %v1907_v38, %v3660_v8 }
 0x380   :  { %v2061_v25 = vmax.f32 %v2045_v45, 0.0 }
 0x382   :  { %2077 = vst.msk [vmem:[%s3951_s4 + $0x78] sm:$0xff] %vm1581_vm1, %v2061_v25  ;;  %v2013_v0 = vpop.permute.xlu1 %2012 }
 0x383   :  { %v2042_v39 = vadd.f32 %v2013_v0, %v1946_v40 }
 0x385   :  { %v2058_v44 = vmax.f32 %v2042_v39, 0.0 }
 0x386   :  { %v2003_v50 = vpop.permute.xlu1 %2002 }
 0x387   :  { %2074 = vst.msk [vmem:[%s3951_s4 + $0x60] sm:$0xff] %vm1581_vm1, %v2058_v44  ;;  %v2040_v31 = vadd.f32 %v2003_v50, %v1944_v30 }
 0x389   :  { %v2056_v7 = vmax.f32 %v2040_v31, 0.0 }
 0x38a   :  { %v2023_v37 = vpop.permute.xlu1 %2022 }
 0x38b   :  { %2072 = vst.msk [vmem:[%s3951_s4 + $0x50] sm:$0xff] %vm1581_vm1, %v2056_v7  ;;  %v2044_v21 = vadd.f32 %v2023_v37, %v1948_v57 }
 0x38d   :  { %v2060_v15 = vmax.f32 %v2044_v21, 0.0 }
 0x38f   :  { %2076 = vst.msk [vmem:[%s3951_s4 + $0x70] sm:$0xff] %vm1581_vm1, %v2060_v15 }

</bundles_post_ra>
